<compile_context>
chip_gen: v7x
topology: tpu7x:2x2x1
jax: 0.10.0
libtpu: 0.0.40
codegen_flags: <defaults>
</compile_context>

<pallas_src>
import functools
import math

import numpy as np
import jax
import jax.numpy as jnp
from jax.experimental import pallas as pl
from jax.experimental.pallas import tpu as pltpu


# ------------------------------- helpers ----------------------------------- #

def _round_up(x, m):
    return ((x + m - 1) // m) * m


VMEM_BUDGET_BYTES = 26 * 1024 * 1024   # conservative: leaves headroom on v7x
VMEM_LIMIT_BYTES = 48 * 1024 * 1024    # explicit scoped-VMEM limit (< 64 MiB)


def _conv_tile_bytes(NR, tk, tn, out_bytes):
    """Rough double-buffered working-set estimate for one conv matmul tile."""
    wt = 2 * NR * tk * 2          # bf16 weight tile, double-buffered
    pt = 2 * tk * tn * 2          # bf16 patch tile, double-buffered
    acc = NR * tn * 4             # f32 accumulator scratch
    out = 2 * NR * tn * out_bytes  # output tile, double-buffered
    return wt + pt + acc + out + 8192


def _plan_conv(NR, K, out_bytes):
    """Pick (Kp, tk, tn_cap) for the (NR, K) x (K, M) conv matmul.
    Prefer whole-K residency with the widest lane tile; fall back to K-tiling
    (grid reduction axis) when the working set would blow the VMEM budget
    (needed at PyTorch-default sizes, esp. on v7x)."""
    kp = _round_up(K, 16)                        # bf16 sublane packing
    for tn in (2048, 1024, 512, 256, 128):
        if _conv_tile_bytes(NR, kp, tn, out_bytes) <= VMEM_BUDGET_BYTES:
            return {"K": K, "Kp": kp, "tk": kp, "tn_cap": tn}
    for tk in (4096, 2048, 1024, 512, 256, 128):  # tk multiple of 128
        for tn in (1024, 512, 256, 128):
            if _conv_tile_bytes(NR, tk, tn, out_bytes) <= VMEM_BUDGET_BYTES:
                return {"K": K, "Kp": _round_up(K, tk), "tk": tk, "tn_cap": tn}
    return {"K": K, "Kp": _round_up(K, 128), "tk": 128, "tn_cap": 128}


# ------------------------------ model config ------------------------------- #

IN_CHANNELS = 16        # (PyTorch default 512; scaled down for the demo)
OUT_DIM = 32            # (PyTorch default 64)
OUT_CHANNELS = 1
NOISE_DIM = 16          # (PyTorch default 200)

IN_DIM = math.ceil(OUT_DIM / 16)
_DIF16 = 16 * IN_DIM - OUT_DIM
CUT1 = _DIF16 % 16 // 8
CUT2 = _DIF16 % 8 // 4
CUT3 = _DIF16 % 4 // 2
CUT4 = _DIF16 % 2 // 1
C1 = int(IN_CHANNELS / 2.0)
C2 = int(C1 / 2)
C3 = int(C2 / 2)
BN_EPS = 1e-5

# (name, Cin, Cout, output dtype bytes).  Plans are static module-level ints so
# both prepare_params (host) and the jitted forward derive the identical tiling.
_CONV_LAYOUT = (
    ("conv1", IN_CHANNELS, C1, 2),
    ("conv2", C1, C2, 2),
    ("conv3", C2, C3, 2),
    ("conv4", C3, OUT_CHANNELS, 4),
)
_CONV_PLANS = {name: _plan_conv(8 * cout, 27 * cin, ob)
               for name, cin, cout, ob in _CONV_LAYOUT}


# ----------------------------- Pallas kernels ------------------------------ #

def _linear_kernel(a_ref, b_ref, o_ref):
    # Tiny layer; HIGHEST precision so layer-1 BN stats see a true fp32 GEMM.
    o_ref[...] = jnp.dot(a_ref[...], b_ref[...],
                         precision=jax.lax.Precision.HIGHEST,
                         preferred_element_type=jnp.float32).astype(o_ref.dtype)


def _convT_bn_kernel(w_ref, p_ref, o_ref, sum_ref, sq_ref, acc_ref, *, nk):
    """One (column tile, K tile) step of (8*Cout, M) = Wmat @ patches.
    Accumulates over the K grid axis in an f32 VMEM scratch; on the last K step
    stores the bf16 tile and emits per-column-tile BatchNorm partial sums so
    the column axis can stay 'parallel' (v7x megacore)."""
    k = pl.program_id(1)

    @pl.when(k == 0)
    def _():
        acc_ref[...] = jnp.zeros_like(acc_ref)

    acc_ref[...] += jnp.dot(w_ref[...], p_ref[...],
                            preferred_element_type=jnp.float32)

    @pl.when(k == nk - 1)
    def _():
        y = acc_ref[...]
        o_ref[...] = y.astype(o_ref.dtype)
        # Zero-padded K rows / M columns contribute 0 to both sums; the wrapper
        # divides by the true element count.  Do NOT change the pad value.
        sum_ref[0] = jnp.sum(y, axis=1, keepdims=True)
        sq_ref[0] = jnp.sum(y * y, axis=1, keepdims=True)


def _convT_act_kernel(w_ref, p_ref, o_ref, acc_ref, *, nk, act):
    """Conv matmul tile with K accumulation and a fused elementwise activation
    (used for conv4 + Sigmoid; no BN)."""
    k = pl.program_id(1)

    @pl.when(k == 0)
    def _():
        acc_ref[...] = jnp.zeros_like(acc_ref)

    acc_ref[...] += jnp.dot(w_ref[...], p_ref[...],
                            preferred_element_type=jnp.float32)

    @pl.when(k == nk - 1)
    def _():
        y = acc_ref[...]
        if act == "sigmoid":
            y = jax.nn.sigmoid(y)
        elif act == "relu":
            y = jnp.maximum(y, 0.0)
        o_ref[...] = y.astype(o_ref.dtype)


# ----------------------------- Pallas wrappers ----------------------------- #

def pallas_linear(x, wb):
    """(B, K) @ (K+1, N) with the bias folded in as the last weight row."""
    Bm, K = x.shape
    N = wb.shape[1]
    a = jnp.concatenate([x, jnp.ones((Bm, 1), x.dtype)], axis=1)   # bias column
    Mp = _round_up(Bm, 8)
    if Mp != Bm:
        a = jnp.pad(a, ((0, Mp - Bm), (0, 0)))
    out = pl.pallas_call(
        _linear_kernel,
        out_shape=jax.ShapeDtypeStruct((Mp, N), jnp.float32),
        grid=(1,),
        in_specs=[pl.BlockSpec((Mp, K + 1), lambda i: (0, 0)),
                  pl.BlockSpec((K + 1, N), lambda i: (0, 0))],
        out_specs=pl.BlockSpec((Mp, N), lambda i: (0, 0)),
        compiler_params=pltpu.CompilerParams(
            dimension_semantics=("arbitrary",)),
    )(a, wb)
    return out[:Bm]


def convT_pallas(patches, wmat_p, plan, out_dtype, act, with_stats):
    """Wmat (NR, Kp) bf16 (pre-padded) @ patches (K, M).

    Returns (y (NR, Mp), psum, psq, Mp) where psum/psq are per-column-tile
    BatchNorm partial sums of shape (ncol, NR, 1) (None when with_stats=False).
    """
    NR, Kp = wmat_p.shape
    K = plan["K"]
    tk = plan["tk"]
    assert Kp == plan["Kp"]
    M = patches.shape[1]

    tn = min(plan["tn_cap"], _round_up(M, 128))    # lane-dense column tile
    Mp = _round_up(M, tn)
    nk = Kp // tk
    ncol = Mp // tn

    p = jnp.pad(patches.astype(jnp.bfloat16), ((0, Kp - K), (0, Mp - M)))

    grid = (ncol, nk)                               # reduction (K) axis last
    w_spec = pl.BlockSpec((NR, tk), lambda i, k: (0, k))
    p_spec = pl.BlockSpec((tk, tn), lambda i, k: (k, i))
    o_spec = pl.BlockSpec((NR, tn), lambda i, k: (0, i))
    scratch = [pltpu.VMEM((NR, tn), jnp.float32)]
    cparams = pltpu.CompilerParams(
        dimension_semantics=("parallel", "arbitrary"),
        vmem_limit_bytes=VMEM_LIMIT_BYTES)

    if with_stats:
        y, psum, psq = pl.pallas_call(
            functools.partial(_convT_bn_kernel, nk=nk),
            out_shape=(jax.ShapeDtypeStruct((NR, Mp), out_dtype),
                       jax.ShapeDtypeStruct((ncol, NR, 1), jnp.float32),
                       jax.ShapeDtypeStruct((ncol, NR, 1), jnp.float32)),
            grid=grid,
            in_specs=[w_spec, p_spec],
            out_specs=(o_spec,
                       pl.BlockSpec((1, NR, 1), lambda i, k: (i, 0, 0)),
                       pl.BlockSpec((1, NR, 1), lambda i, k: (i, 0, 0))),
            scratch_shapes=scratch,
            compiler_params=cparams,
        )(wmat_p, p)
        return y, psum, psq, Mp

    y = pl.pallas_call(
        functools.partial(_convT_act_kernel, nk=nk, act=act),
        out_shape=jax.ShapeDtypeStruct((NR, Mp), out_dtype),
        grid=grid,
        in_specs=[w_spec, p_spec],
        out_specs=o_spec,
        scratch_shapes=scratch,
        compiler_params=cparams,
    )(wmat_p, p)
    return y, None, None, Mp


# ----------------- ConvTranspose3d (k=4, s=2, p=1) as one matmul ------------ #
# Output position o = 2*i - 1 + k.  Parity p of o selects 2 taps per spatial
# dim: with xp = pad(x, 1) the tap at shift a = p + t (t in {0,1}) pairs with
# kernel index k = 3 - p - 2t.  All 8 parities share one 3x3x3 shift window.

def _build_wmat_host(w):
    """PyTorch ConvTranspose3d weight (Cin, Cout, 4,4,4) -> parity-decomposed
    dense matrix (8*Cout, 27*Cin).  Host-side numpy, run ONCE per param set."""
    w = np.asarray(w, dtype=np.float32)
    Cin, Cout = w.shape[0], w.shape[1]
    blocks = np.zeros((8, Cout, 27, Cin), np.float32)
    for pd in range(2):
        for ph in range(2):
            for pw in range(2):
                p = pd * 4 + ph * 2 + pw
                for td in range(2):
                    for th in range(2):
                        for tw in range(2):
                            ad, ah, aw = pd + td, ph + th, pw + tw
                            kd = 3 - pd - 2 * td
                            kh = 3 - ph - 2 * th
                            kw = 3 - pw - 2 * tw
                            tap = ad * 9 + ah * 3 + aw
                            blocks[p, :, tap, :] = w[:, :, kd, kh, kw].T
    return blocks.reshape(8 * Cout, 27 * Cin)


def _build_patches_cf(vol_cf):
    """vol_cf (Cin, B, D, H, W) -> 27-tap matrix (27*Cin, B*D*H*W), bf16 in/out.
    TODO(synk): fuse this gather into the conv kernel (shifted pl.ds windows of
    the once-padded VMEM-resident volume) to kill the 27x im2col HBM round trip
    at PyTorch-default sizes."""
    Cin, B, D, H, W = vol_cf.shape
    xp = jnp.pad(vol_cf, ((0, 0), (0, 0), (1, 1), (1, 1), (1, 1)))
    taps = [xp[:, :, a:a + D, b:b + H, c:c + W]
            for a in range(3) for b in range(3) for c in range(3)]
    pat = jnp.stack(taps, axis=0)                     # (27, Cin, B, D, H, W)
    return pat.reshape(27 * Cin, B * D * H * W)


def _assemble_bn_relu(y, Cout, B, D, H, W, scale_c=None, shift_c=None,
                      relu=False, out_dtype=jnp.bfloat16):
    """y (8*Cout, M) parity-major rows -> (Cout, B, 2D, 2H, 2W).  The optional
    per-channel BatchNorm affine + ReLU is applied inside the same XLA
    de-interleave (fused elementwise) so the activation takes no extra HBM
    round trip.  TODO(synk): fold this interleave into the Pallas output path /
    the next layer's patch index_map."""
    y = y.astype(jnp.float32).reshape(2, 2, 2, Cout, B, D, H, W)
    if scale_c is not None:
        bshape = (1, 1, 1, Cout, 1, 1, 1, 1)
        y = y * scale_c.reshape(bshape) + shift_c.reshape(bshape)
    if relu:
        y = jnp.maximum(y, 0.0)
    y = jnp.transpose(y, (3, 4, 5, 0, 6, 1, 7, 2))    # (co,b,d,pd,h,ph,w,pw)
    return y.reshape(Cout, B, 2 * D, 2 * H, 2 * W).astype(out_dtype)


def _cut_cf(vol, c):
    """cut() of the padding variant: drop `c` trailing slices per spatial dim."""
    if c == 0:
        return vol
    _, _, D, H, W = vol.shape
    return vol[:, :, :D - c, :H - c, :W - c]


# ------------------------------ params ------------------------------------- #

def init_params(key):
    ks = jax.random.split(key, 10)
    lin_out = IN_CHANNELS * IN_DIM * IN_DIM * IN_DIM
    return {
        "linear_w": 0.1 * jax.random.normal(ks[0], (lin_out, NOISE_DIM), jnp.float32),
        "linear_b": 0.01 * jax.random.normal(ks[1], (lin_out,), jnp.float32),
        "conv1_w": 0.05 * jax.random.normal(ks[2], (IN_CHANNELS, C1, 4, 4, 4), jnp.float32),
        "conv2_w": 0.05 * jax.random.normal(ks[3], (C1, C2, 4, 4, 4), jnp.float32),
        "conv3_w": 0.05 * jax.random.normal(ks[4], (C2, C3, 4, 4, 4), jnp.float32),
        "conv4_w": 0.05 * jax.random.normal(ks[5], (C3, OUT_CHANNELS, 4, 4, 4), jnp.float32),
        "bn1_gamma": 1.0 + 0.1 * jax.random.normal(ks[6], (C1,), jnp.float32),
        "bn1_beta": 0.1 * jax.random.normal(ks[7], (C1,), jnp.float32),
        "bn2_gamma": 1.0 + 0.1 * jax.random.normal(ks[8], (C2,), jnp.float32),
        "bn2_beta": 0.1 * jax.random.normal(ks[9], (C2,), jnp.float32),
        "bn3_gamma": jnp.ones((C3,), jnp.float32),
        "bn3_beta": jnp.zeros((C3,), jnp.float32),
    }


def prepare_params(params):
    """One-time host-side preprocessing (hoisted out of the jitted forward):
    parity-decomposed, bf16, K-padded conv weight matrices built with plain
    numpy (no per-call XLA scatters), and the linear weight pre-transposed with
    its bias folded in as an extra row."""
    prep = {}
    lw = np.asarray(params["linear_w"], np.float32)      # (lin_out, NOISE_DIM)
    lb = np.asarray(params["linear_b"], np.float32)
    prep["linear_wb"] = jnp.asarray(np.concatenate([lw.T, lb[None, :]], axis=0))

    for name, _cin, _cout, _ob in _CONV_LAYOUT:
        wmat = _build_wmat_host(params[f"{name}_w"])     # (8*Cout, 27*Cin)
        NR, K = wmat.shape
        plan = _CONV_PLANS[name]
        wpad = np.zeros((NR, plan["Kp"]), np.float32)
        wpad[:, :K] = wmat
        prep[f"{name}_wmat"] = jnp.asarray(wpad, dtype=jnp.bfloat16)

    for k in ("bn1_gamma", "bn1_beta", "bn2_gamma", "bn2_beta",
              "bn3_gamma", "bn3_beta"):
        prep[k] = params[k]
    return prep


# ------------------------------- forward ----------------------------------- #

def generator_padding_forward(x, prep):
    """x: (B, NOISE_DIM) latent noise.  Returns NCDHW volume like PyTorch."""
    B = x.shape[0]

    # linear (bias folded in as extra row of the prepared weight)
    h = pallas_linear(x, prep["linear_wb"])              # (B, C*d^3) f32

    # project: torch .view(-1, C, d, d, d), then channels-first (C, B, D, H, W)
    vol = h.reshape(B, IN_CHANNELS, IN_DIM, IN_DIM, IN_DIM)
    vol = jnp.transpose(vol, (1, 0, 2, 3, 4)).astype(jnp.bfloat16)

    cuts = (CUT1, CUT2, CUT3, CUT4)
    for li, Cout in ((1, C1), (2, C2), (3, C3)):
        _, Bv, D, H, W = vol.shape
        M = Bv * D * H * W
        plan = _CONV_PLANS[f"conv{li}"]

        patches = _build_patches_cf(vol)                 # (27*Cin, M) bf16
        y, psum, psq, _ = convT_pallas(patches, prep[f"conv{li}_wmat"], plan,
                                       out_dtype=jnp.bfloat16, act=None,
                                       with_stats=True)

        # training-mode BatchNorm (biased variance) over all 8*M output voxels,
        # reduced from the per-column-tile partial sums emitted by the kernel.
        count = 8.0 * M
        s_c = psum.sum(axis=0).reshape(8, Cout).sum(axis=0)
        sq_c = psq.sum(axis=0).reshape(8, Cout).sum(axis=0)
        mean = s_c / count
        var = jnp.maximum(sq_c / count - mean * mean, 0.0)
        # TODO(synk): per-tile centered (Welford) sums at PyTorch-default sizes;
        # E[x^2]-mean^2 can cancel in f32 for very large counts.
        scale_c = prep[f"bn{li}_gamma"] * jax.lax.rsqrt(var + BN_EPS)
        shift_c = prep[f"bn{li}_beta"] - mean * scale_c

        # BN affine + ReLU fused into the parity de-interleave (one XLA pass).
        vol = _assemble_bn_relu(y[:, :M], Cout, Bv, D, H, W,
                                scale_c=scale_c, shift_c=shift_c, relu=True,
                                out_dtype=jnp.bfloat16)
        vol = _cut_cf(vol, cuts[li - 1])

    # conv4 (no BN) with fused Sigmoid; cut afterwards (elementwise commutes).
    # NR = 8*Cout = 8 rows here -> bandwidth-bound; MXU row fill irrelevant.
    _, Bv, D, H, W = vol.shape
    M = Bv * D * H * W
    patches = _build_patches_cf(vol)
    y, _, _, _ = convT_pallas(patches, prep["conv4_wmat"], _CONV_PLANS["conv4"],
                              out_dtype=jnp.float32, act="sigmoid",
                              with_stats=False)
    vol = _assemble_bn_relu(y[:, :M], OUT_CHANNELS, Bv, D, H, W,
                            out_dtype=jnp.float32)
    vol = _cut_cf(vol, cuts[3])

    # channels-first (C, B, D, H, W) -> PyTorch NCDHW (B, C, D, H, W)
    return jnp.transpose(vol, (1, 0, 2, 3, 4))


if __name__ == "__main__":
    key = jax.random.PRNGKey(0)
    k_param, k_in = jax.random.split(key)
    params = init_params(k_param)
    prep = prepare_params(params)            # one-time host-side weight prep
    noise = jax.random.normal(k_in, (2, NOISE_DIM), jnp.float32)

    fwd = jax.jit(generator_padding_forward)
    out = fwd(noise, prep)
    out = jax.block_until_ready(out)

    assert out.shape == (2, OUT_CHANNELS, OUT_DIM, OUT_DIM, OUT_DIM), out.shape
    assert bool(jnp.all(jnp.isfinite(out)))
    assert bool(jnp.all((out >= 0.0) & (out <= 1.0)))  # sigmoid range
    print("KERNEL_OK")
</pallas_src>

<mosaic_0001>
module attributes {stable_mosaic.version = 11 : i64} {
  func.func @_linear_kernel(%arg0: i32, %arg1: memref<8x17xf32, #tpu.memory_space<vmem>>, %arg2: memref<17x128xf32, #tpu.memory_space<vmem>>, %arg3: memref<8x128xf32, #tpu.memory_space<vmem>>) attributes {dimension_semantics = [#tpu.dimension_semantics<arbitrary>], iteration_bounds = array<i64: 1>, scalar_prefetch = 0 : i64, scratch_operands = 0 : i64, tpu.core_type = #tpu.core_type<tc>, window_params = [{pipeline_mode = #tpu.pipeline_mode<synchronous>, transform_indices = @transform_0, window_bounds = array<i64: 8, 17>}, {pipeline_mode = #tpu.pipeline_mode<synchronous>, transform_indices = @transform_1, window_bounds = array<i64: 17, 128>}, {pipeline_mode = #tpu.pipeline_mode<synchronous>, transform_indices = @transform_2, window_bounds = array<i64: 8, 128>}]} {
    %c0 = arith.constant 0 : index
    %c0_0 = arith.constant 0 : index
    %0 = vector.load %arg1[%c0, %c0_0] : memref<8x17xf32, #tpu.memory_space<vmem>>, vector<8x17xf32>
    %c0_1 = arith.constant 0 : index
    %c0_2 = arith.constant 0 : index
    %1 = vector.load %arg2[%c0_1, %c0_2] : memref<17x128xf32, #tpu.memory_space<vmem>>, vector<17x128xf32>
    %cst = arith.constant dense<0.000000e+00> : vector<8x128xf32>
    %2 = tpu.matmul %0, %1, %cst {dimension_numbers = #tpu.dot_dimension_numbers<[1], [0], [0], [1], [0, 0, 1, 1], [], []>, precision = #tpu.contract_precision<fp32>} : vector<8x17xf32>, vector<17x128xf32>, vector<8x128xf32> -> vector<8x128xf32>
    %c0_3 = arith.constant 0 : index
    %c0_4 = arith.constant 0 : index
    %3 = vector.load %arg3[%c0_3, %c0_4] : memref<8x128xf32, #tpu.memory_space<vmem>>, vector<8x128xf32>
    tpu.vector_store %arg3[%c0_3, %c0_4], %2 {strides = array<i32>} : memref<8x128xf32, #tpu.memory_space<vmem>>, vector<8x128xf32>,
    return
  }
  func.func @transform_0(%arg0: i32) -> (i32, i32) {
    %c0_i32 = arith.constant 0 : i32
    %c0_i32_0 = arith.constant 0 : i32
    %c0_i32_1 = arith.constant 0 : i32
    return %c0_i32, %c0_i32_0 : i32, i32
  }
  func.func @transform_1(%arg0: i32) -> (i32, i32) {
    %c0_i32 = arith.constant 0 : i32
    %c0_i32_0 = arith.constant 0 : i32
    %c0_i32_1 = arith.constant 0 : i32
    return %c0_i32, %c0_i32_0 : i32, i32
  }
  func.func @transform_2(%arg0: i32) -> (i32, i32) {
    %c0_i32 = arith.constant 0 : i32
    %c0_i32_0 = arith.constant 0 : i32
    %c0_i32_1 = arith.constant 0 : i32
    return %c0_i32, %c0_i32_0 : i32, i32
  }
}

module attributes {stable_mosaic.version = 11 : i64} {
  func.func @_convT_bn_kernel(%arg0: i32, %arg1: i32, %arg2: memref<64x432xbf16, #tpu.memory_space<vmem>>, %arg3: memref<432x128xbf16, #tpu.memory_space<vmem>>, %arg4: memref<64x128xbf16, #tpu.memory_space<vmem>>, %arg5: memref<1x64x1xf32, #tpu.memory_space<vmem>>, %arg6: memref<1x64x1xf32, #tpu.memory_space<vmem>>, %arg7: memref<64x128xf32, #tpu.memory_space<vmem>>) attributes {dimension_semantics = [#tpu.dimension_semantics<parallel>, #tpu.dimension_semantics<arbitrary>], iteration_bounds = array<i64: 1, 1>, scalar_prefetch = 0 : i64, scratch_operands = 1 : i64, tpu.core_type = #tpu.core_type<tc>, window_params = [{transform_indices = @transform_0, window_bounds = array<i64: 64, 432>}, {transform_indices = @transform_1, window_bounds = array<i64: 432, 128>}, {transform_indices = @transform_2, window_bounds = array<i64: 64, 128>}, {transform_indices = @transform_3, window_bounds = array<i64: 1, 64, 1>}, {transform_indices = @transform_4, window_bounds = array<i64: 1, 64, 1>}]} {
    %c0_i32 = arith.constant 0 : i32
    %0 = arith.cmpi eq, %arg1, %c0_i32 : i32
    %1 = arith.extui %0 : i1 to i32
    %c0_i32_0 = arith.constant 0 : i32
    %2 = arith.cmpi ne, %1, %c0_i32_0 : i32
    scf.if %2 {
      %cst_10 = arith.constant 0.000000e+00 : f32
      %12 = vector.broadcast %cst_10 : f32 to vector<64x128xf32>
      %c0_11 = arith.constant 0 : index
      %c0_12 = arith.constant 0 : index
      %13 = vector.load %arg7[%c0_11, %c0_12] : memref<64x128xf32, #tpu.memory_space<vmem>>, vector<64x128xf32>
      tpu.vector_store %arg7[%c0_11, %c0_12], %12 {strides = array<i32>} : memref<64x128xf32, #tpu.memory_space<vmem>>, vector<64x128xf32>,
    } else {
    }
    %c0 = arith.constant 0 : index
    %c0_1 = arith.constant 0 : index
    %3 = vector.load %arg7[%c0, %c0_1] : memref<64x128xf32, #tpu.memory_space<vmem>>, vector<64x128xf32>
    %c0_2 = arith.constant 0 : index
    %c0_3 = arith.constant 0 : index
    %4 = vector.load %arg2[%c0_2, %c0_3] : memref<64x432xbf16, #tpu.memory_space<vmem>>, vector<64x432xbf16>
    %c0_4 = arith.constant 0 : index
    %c0_5 = arith.constant 0 : index
    %5 = vector.load %arg3[%c0_4, %c0_5] : memref<432x128xbf16, #tpu.memory_space<vmem>>, vector<432x128xbf16>
    %cst = arith.constant dense<0.000000e+00> : vector<64x128xf32>
    %6 = tpu.matmul %4, %5, %cst {dimension_numbers = #tpu.dot_dimension_numbers<[1], [0], [0], [1], [0, 0, 1, 1], [], []>} : vector<64x432xbf16>, vector<432x128xbf16>, vector<64x128xf32> -> vector<64x128xf32>
    %7 = arith.addf %3, %6 : vector<64x128xf32>
    %c0_6 = arith.constant 0 : index
    %c0_7 = arith.constant 0 : index
    %8 = vector.load %arg7[%c0_6, %c0_7] : memref<64x128xf32, #tpu.memory_space<vmem>>, vector<64x128xf32>
    tpu.vector_store %arg7[%c0_6, %c0_7], %7 {strides = array<i32>} : memref<64x128xf32, #tpu.memory_space<vmem>>, vector<64x128xf32>,
    %c0_i32_8 = arith.constant 0 : i32
    %9 = arith.cmpi eq, %arg1, %c0_i32_8 : i32
    %10 = arith.extui %9 : i1 to i32
    %c0_i32_9 = arith.constant 0 : i32
    %11 = arith.cmpi ne, %10, %c0_i32_9 : i32
    scf.if %11 {
      %c0_10 = arith.constant 0 : index
      %c0_11 = arith.constant 0 : index
      %12 = vector.load %arg7[%c0_10, %c0_11] : memref<64x128xf32, #tpu.memory_space<vmem>>, vector<64x128xf32>
      %13 = arith.truncf %12 : vector<64x128xf32> to vector<64x128xbf16>
      %c0_12 = arith.constant 0 : index
      %c0_13 = arith.constant 0 : index
      %14 = vector.load %arg4[%c0_12, %c0_13] : memref<64x128xbf16, #tpu.memory_space<vmem>>, vector<64x128xbf16>
      tpu.vector_store %arg4[%c0_12, %c0_13], %13 {strides = array<i32>} : memref<64x128xbf16, #tpu.memory_space<vmem>>, vector<64x128xbf16>,
      %cst_14 = arith.constant dense<0.000000e+00> : vector<64xf32>
      %15 = vector.multi_reduction <add>, %12, %cst_14 [1] : vector<64x128xf32> to vector<64xf32>
      %16 = vector.shape_cast %15 : vector<64xf32> to vector<64x1xf32>
      %c0_15 = arith.constant 0 : index
      %c0_16 = arith.constant 0 : index
      %c0_17 = arith.constant 0 : index
      %17 = vector.load %arg5[%c0_15, %c0_16, %c0_17] : memref<1x64x1xf32, #tpu.memory_space<vmem>>, vector<1x64x1xf32>
      %18 = vector.shape_cast %17 : vector<1x64x1xf32> to vector<64x1xf32>
      %19 = vector.shape_cast %16 : vector<64x1xf32> to vector<1x64x1xf32>
      tpu.vector_store %arg5[%c0_15, %c0_16, %c0_17], %19 {strides = array<i32>} : memref<1x64x1xf32, #tpu.memory_space<vmem>>, vector<1x64x1xf32>,
      %20 = arith.mulf %12, %12 : vector<64x128xf32>
      %cst_18 = arith.constant dense<0.000000e+00> : vector<64xf32>
      %21 = vector.multi_reduction <add>, %20, %cst_18 [1] : vector<64x128xf32> to vector<64xf32>
      %22 = vector.shape_cast %21 : vector<64xf32> to vector<64x1xf32>
      %c0_19 = arith.constant 0 : index
      %c0_20 = arith.constant 0 : index
      %c0_21 = arith.constant 0 : index
      %23 = vector.load %arg6[%c0_19, %c0_20, %c0_21] : memref<1x64x1xf32, #tpu.memory_space<vmem>>, vector<1x64x1xf32>
      %24 = vector.shape_cast %23 : vector<1x64x1xf32> to vector<64x1xf32>
      %25 = vector.shape_cast %22 : vector<64x1xf32> to vector<1x64x1xf32>
      tpu.vector_store %arg6[%c0_19, %c0_20, %c0_21], %25 {strides = array<i32>} : memref<1x64x1xf32, #tpu.memory_space<vmem>>, vector<1x64x1xf32>,
    } else {
    }
    return
  }
  func.func @transform_0(%arg0: i32, %arg1: i32) -> (i32, i32) {
    %c0_i32 = arith.constant 0 : i32
    %c0_i32_0 = arith.constant 0 : i32
    return %c0_i32, %arg1 : i32, i32
  }
  func.func @transform_1(%arg0: i32, %arg1: i32) -> (i32, i32) {
    %c0_i32 = arith.constant 0 : i32
    return %arg1, %arg0 : i32, i32
  }
  func.func @transform_2(%arg0: i32, %arg1: i32) -> (i32, i32) {
    %c0_i32 = arith.constant 0 : i32
    %c0_i32_0 = arith.constant 0 : i32
    return %c0_i32, %arg0 : i32, i32
  }
  func.func @transform_3(%arg0: i32, %arg1: i32) -> (i32, i32, i32) {
    %c0_i32 = arith.constant 0 : i32
    %c0_i32_0 = arith.constant 0 : i32
    %c0_i32_1 = arith.constant 0 : i32
    return %arg0, %c0_i32, %c0_i32_0 : i32, i32, i32
  }
  func.func @transform_4(%arg0: i32, %arg1: i32) -> (i32, i32, i32) {
    %c0_i32 = arith.constant 0 : i32
    %c0_i32_0 = arith.constant 0 : i32
    %c0_i32_1 = arith.constant 0 : i32
    return %arg0, %c0_i32, %c0_i32_0 : i32, i32, i32
  }
}

module attributes {stable_mosaic.version = 11 : i64} {
  func.func @_convT_bn_kernel(%arg0: i32, %arg1: i32, %arg2: memref<32x224xbf16, #tpu.memory_space<vmem>>, %arg3: memref<224x128xbf16, #tpu.memory_space<vmem>>, %arg4: memref<32x128xbf16, #tpu.memory_space<vmem>>, %arg5: memref<1x32x1xf32, #tpu.memory_space<vmem>>, %arg6: memref<1x32x1xf32, #tpu.memory_space<vmem>>, %arg7: memref<32x128xf32, #tpu.memory_space<vmem>>) attributes {dimension_semantics = [#tpu.dimension_semantics<parallel>, #tpu.dimension_semantics<arbitrary>], iteration_bounds = array<i64: 1, 1>, scalar_prefetch = 0 : i64, scratch_operands = 1 : i64, tpu.core_type = #tpu.core_type<tc>, window_params = [{transform_indices = @transform_0, window_bounds = array<i64: 32, 224>}, {transform_indices = @transform_1, window_bounds = array<i64: 224, 128>}, {transform_indices = @transform_2, window_bounds = array<i64: 32, 128>}, {transform_indices = @transform_3, window_bounds = array<i64: 1, 32, 1>}, {transform_indices = @transform_4, window_bounds = array<i64: 1, 32, 1>}]} {
    %c0_i32 = arith.constant 0 : i32
    %0 = arith.cmpi eq, %arg1, %c0_i32 : i32
    %1 = arith.extui %0 : i1 to i32
    %c0_i32_0 = arith.constant 0 : i32
    %2 = arith.cmpi ne, %1, %c0_i32_0 : i32
    scf.if %2 {
      %cst_10 = arith.constant 0.000000e+00 : f32
      %12 = vector.broadcast %cst_10 : f32 to vector<32x128xf32>
      %c0_11 = arith.constant 0 : index
      %c0_12 = arith.constant 0 : index
      %13 = vector.load %arg7[%c0_11, %c0_12] : memref<32x128xf32, #tpu.memory_space<vmem>>, vector<32x128xf32>
      tpu.vector_store %arg7[%c0_11, %c0_12], %12 {strides = array<i32>} : memref<32x128xf32, #tpu.memory_space<vmem>>, vector<32x128xf32>,
    } else {
    }
    %c0 = arith.constant 0 : index
    %c0_1 = arith.constant 0 : index
    %3 = vector.load %arg7[%c0, %c0_1] : memref<32x128xf32, #tpu.memory_space<vmem>>, vector<32x128xf32>
    %c0_2 = arith.constant 0 : index
    %c0_3 = arith.constant 0 : index
    %4 = vector.load %arg2[%c0_2, %c0_3] : memref<32x224xbf16, #tpu.memory_space<vmem>>, vector<32x224xbf16>
    %c0_4 = arith.constant 0 : index
    %c0_5 = arith.constant 0 : index
    %5 = vector.load %arg3[%c0_4, %c0_5] : memref<224x128xbf16, #tpu.memory_space<vmem>>, vector<224x128xbf16>
    %cst = arith.constant dense<0.000000e+00> : vector<32x128xf32>
    %6 = tpu.matmul %4, %5, %cst {dimension_numbers = #tpu.dot_dimension_numbers<[1], [0], [0], [1], [0, 0, 1, 1], [], []>} : vector<32x224xbf16>, vector<224x128xbf16>, vector<32x128xf32> -> vector<32x128xf32>
    %7 = arith.addf %3, %6 : vector<32x128xf32>
    %c0_6 = arith.constant 0 : index
    %c0_7 = arith.constant 0 : index
    %8 = vector.load %arg7[%c0_6, %c0_7] : memref<32x128xf32, #tpu.memory_space<vmem>>, vector<32x128xf32>
    tpu.vector_store %arg7[%c0_6, %c0_7], %7 {strides = array<i32>} : memref<32x128xf32, #tpu.memory_space<vmem>>, vector<32x128xf32>,
    %c0_i32_8 = arith.constant 0 : i32
    %9 = arith.cmpi eq, %arg1, %c0_i32_8 : i32
    %10 = arith.extui %9 : i1 to i32
    %c0_i32_9 = arith.constant 0 : i32
    %11 = arith.cmpi ne, %10, %c0_i32_9 : i32
    scf.if %11 {
      %c0_10 = arith.constant 0 : index
      %c0_11 = arith.constant 0 : index
      %12 = vector.load %arg7[%c0_10, %c0_11] : memref<32x128xf32, #tpu.memory_space<vmem>>, vector<32x128xf32>
      %13 = arith.truncf %12 : vector<32x128xf32> to vector<32x128xbf16>
      %c0_12 = arith.constant 0 : index
      %c0_13 = arith.constant 0 : index
      %14 = vector.load %arg4[%c0_12, %c0_13] : memref<32x128xbf16, #tpu.memory_space<vmem>>, vector<32x128xbf16>
      tpu.vector_store %arg4[%c0_12, %c0_13], %13 {strides = array<i32>} : memref<32x128xbf16, #tpu.memory_space<vmem>>, vector<32x128xbf16>,
      %cst_14 = arith.constant dense<0.000000e+00> : vector<32xf32>
      %15 = vector.multi_reduction <add>, %12, %cst_14 [1] : vector<32x128xf32> to vector<32xf32>
      %16 = vector.shape_cast %15 : vector<32xf32> to vector<32x1xf32>
      %c0_15 = arith.constant 0 : index
      %c0_16 = arith.constant 0 : index
      %c0_17 = arith.constant 0 : index
      %17 = vector.load %arg5[%c0_15, %c0_16, %c0_17] : memref<1x32x1xf32, #tpu.memory_space<vmem>>, vector<1x32x1xf32>
      %18 = vector.shape_cast %17 : vector<1x32x1xf32> to vector<32x1xf32>
      %19 = vector.shape_cast %16 : vector<32x1xf32> to vector<1x32x1xf32>
      tpu.vector_store %arg5[%c0_15, %c0_16, %c0_17], %19 {strides = array<i32>} : memref<1x32x1xf32, #tpu.memory_space<vmem>>, vector<1x32x1xf32>,
      %20 = arith.mulf %12, %12 : vector<32x128xf32>
      %cst_18 = arith.constant dense<0.000000e+00> : vector<32xf32>
      %21 = vector.multi_reduction <add>, %20, %cst_18 [1] : vector<32x128xf32> to vector<32xf32>
      %22 = vector.shape_cast %21 : vector<32xf32> to vector<32x1xf32>
      %c0_19 = arith.constant 0 : index
      %c0_20 = arith.constant 0 : index
      %c0_21 = arith.constant 0 : index
      %23 = vector.load %arg6[%c0_19, %c0_20, %c0_21] : memref<1x32x1xf32, #tpu.memory_space<vmem>>, vector<1x32x1xf32>
      %24 = vector.shape_cast %23 : vector<1x32x1xf32> to vector<32x1xf32>
      %25 = vector.shape_cast %22 : vector<32x1xf32> to vector<1x32x1xf32>
      tpu.vector_store %arg6[%c0_19, %c0_20, %c0_21], %25 {strides = array<i32>} : memref<1x32x1xf32, #tpu.memory_space<vmem>>, vector<1x32x1xf32>,
    } else {
    }
    return
  }
  func.func @transform_0(%arg0: i32, %arg1: i32) -> (i32, i32) {
    %c0_i32 = arith.constant 0 : i32
    %c0_i32_0 = arith.constant 0 : i32
    return %c0_i32, %arg1 : i32, i32
  }
  func.func @transform_1(%arg0: i32, %arg1: i32) -> (i32, i32) {
    %c0_i32 = arith.constant 0 : i32
    return %arg1, %arg0 : i32, i32
  }
  func.func @transform_2(%arg0: i32, %arg1: i32) -> (i32, i32) {
    %c0_i32 = arith.constant 0 : i32
    %c0_i32_0 = arith.constant 0 : i32
    return %c0_i32, %arg0 : i32, i32
  }
  func.func @transform_3(%arg0: i32, %arg1: i32) -> (i32, i32, i32) {
    %c0_i32 = arith.constant 0 : i32
    %c0_i32_0 = arith.constant 0 : i32
    %c0_i32_1 = arith.constant 0 : i32
    return %arg0, %c0_i32, %c0_i32_0 : i32, i32, i32
  }
  func.func @transform_4(%arg0: i32, %arg1: i32) -> (i32, i32, i32) {
    %c0_i32 = arith.constant 0 : i32
    %c0_i32_0 = arith.constant 0 : i32
    %c0_i32_1 = arith.constant 0 : i32
    return %arg0, %c0_i32, %c0_i32_0 : i32, i32, i32
  }
}

module attributes {stable_mosaic.version = 11 : i64} {
  func.func @_convT_bn_kernel(%arg0: i32, %arg1: i32, %arg2: memref<16x112xbf16, #tpu.memory_space<vmem>>, %arg3: memref<112x1024xbf16, #tpu.memory_space<vmem>>, %arg4: memref<16x1024xbf16, #tpu.memory_space<vmem>>, %arg5: memref<1x16x1xf32, #tpu.memory_space<vmem>>, %arg6: memref<1x16x1xf32, #tpu.memory_space<vmem>>, %arg7: memref<16x1024xf32, #tpu.memory_space<vmem>>) attributes {dimension_semantics = [#tpu.dimension_semantics<parallel>, #tpu.dimension_semantics<arbitrary>], iteration_bounds = array<i64: 1, 1>, scalar_prefetch = 0 : i64, scratch_operands = 1 : i64, tpu.core_type = #tpu.core_type<tc>, window_params = [{transform_indices = @transform_0, window_bounds = array<i64: 16, 112>}, {transform_indices = @transform_1, window_bounds = array<i64: 112, 1024>}, {transform_indices = @transform_2, window_bounds = array<i64: 16, 1024>}, {transform_indices = @transform_3, window_bounds = array<i64: 1, 16, 1>}, {transform_indices = @transform_4, window_bounds = array<i64: 1, 16, 1>}]} {
    %c0_i32 = arith.constant 0 : i32
    %0 = arith.cmpi eq, %arg1, %c0_i32 : i32
    %1 = arith.extui %0 : i1 to i32
    %c0_i32_0 = arith.constant 0 : i32
    %2 = arith.cmpi ne, %1, %c0_i32_0 : i32
    scf.if %2 {
      %cst_10 = arith.constant 0.000000e+00 : f32
      %12 = vector.broadcast %cst_10 : f32 to vector<16x1024xf32>
      %c0_11 = arith.constant 0 : index
      %c0_12 = arith.constant 0 : index
      %13 = vector.load %arg7[%c0_11, %c0_12] : memref<16x1024xf32, #tpu.memory_space<vmem>>, vector<16x1024xf32>
      tpu.vector_store %arg7[%c0_11, %c0_12], %12 {strides = array<i32>} : memref<16x1024xf32, #tpu.memory_space<vmem>>, vector<16x1024xf32>,
    } else {
    }
    %c0 = arith.constant 0 : index
    %c0_1 = arith.constant 0 : index
    %3 = vector.load %arg7[%c0, %c0_1] : memref<16x1024xf32, #tpu.memory_space<vmem>>, vector<16x1024xf32>
    %c0_2 = arith.constant 0 : index
    %c0_3 = arith.constant 0 : index
    %4 = vector.load %arg2[%c0_2, %c0_3] : memref<16x112xbf16, #tpu.memory_space<vmem>>, vector<16x112xbf16>
    %c0_4 = arith.constant 0 : index
    %c0_5 = arith.constant 0 : index
    %5 = vector.load %arg3[%c0_4, %c0_5] : memref<112x1024xbf16, #tpu.memory_space<vmem>>, vector<112x1024xbf16>
    %cst = arith.constant dense<0.000000e+00> : vector<16x1024xf32>
    %6 = tpu.matmul %4, %5, %cst {dimension_numbers = #tpu.dot_dimension_numbers<[1], [0], [0], [1], [0, 0, 1, 1], [], []>} : vector<16x112xbf16>, vector<112x1024xbf16>, vector<16x1024xf32> -> vector<16x1024xf32>
    %7 = arith.addf %3, %6 : vector<16x1024xf32>
    %c0_6 = arith.constant 0 : index
    %c0_7 = arith.constant 0 : index
    %8 = vector.load %arg7[%c0_6, %c0_7] : memref<16x1024xf32, #tpu.memory_space<vmem>>, vector<16x1024xf32>
    tpu.vector_store %arg7[%c0_6, %c0_7], %7 {strides = array<i32>} : memref<16x1024xf32, #tpu.memory_space<vmem>>, vector<16x1024xf32>,
    %c0_i32_8 = arith.constant 0 : i32
    %9 = arith.cmpi eq, %arg1, %c0_i32_8 : i32
    %10 = arith.extui %9 : i1 to i32
    %c0_i32_9 = arith.constant 0 : i32
    %11 = arith.cmpi ne, %10, %c0_i32_9 : i32
    scf.if %11 {
      %c0_10 = arith.constant 0 : index
      %c0_11 = arith.constant 0 : index
      %12 = vector.load %arg7[%c0_10, %c0_11] : memref<16x1024xf32, #tpu.memory_space<vmem>>, vector<16x1024xf32>
      %13 = arith.truncf %12 : vector<16x1024xf32> to vector<16x1024xbf16>
      %c0_12 = arith.constant 0 : index
      %c0_13 = arith.constant 0 : index
      %14 = vector.load %arg4[%c0_12, %c0_13] : memref<16x1024xbf16, #tpu.memory_space<vmem>>, vector<16x1024xbf16>
      tpu.vector_store %arg4[%c0_12, %c0_13], %13 {strides = array<i32>} : memref<16x1024xbf16, #tpu.memory_space<vmem>>, vector<16x1024xbf16>,
      %cst_14 = arith.constant dense<0.000000e+00> : vector<16xf32>
      %15 = vector.multi_reduction <add>, %12, %cst_14 [1] : vector<16x1024xf32> to vector<16xf32>
      %16 = vector.shape_cast %15 : vector<16xf32> to vector<16x1xf32>
      %c0_15 = arith.constant 0 : index
      %c0_16 = arith.constant 0 : index
      %c0_17 = arith.constant 0 : index
      %17 = vector.load %arg5[%c0_15, %c0_16, %c0_17] : memref<1x16x1xf32, #tpu.memory_space<vmem>>, vector<1x16x1xf32>
      %18 = vector.shape_cast %17 : vector<1x16x1xf32> to vector<16x1xf32>
      %19 = vector.shape_cast %16 : vector<16x1xf32> to vector<1x16x1xf32>
      tpu.vector_store %arg5[%c0_15, %c0_16, %c0_17], %19 {strides = array<i32>} : memref<1x16x1xf32, #tpu.memory_space<vmem>>, vector<1x16x1xf32>,
      %20 = arith.mulf %12, %12 : vector<16x1024xf32>
      %cst_18 = arith.constant dense<0.000000e+00> : vector<16xf32>
      %21 = vector.multi_reduction <add>, %20, %cst_18 [1] : vector<16x1024xf32> to vector<16xf32>
      %22 = vector.shape_cast %21 : vector<16xf32> to vector<16x1xf32>
      %c0_19 = arith.constant 0 : index
      %c0_20 = arith.constant 0 : index
      %c0_21 = arith.constant 0 : index
      %23 = vector.load %arg6[%c0_19, %c0_20, %c0_21] : memref<1x16x1xf32, #tpu.memory_space<vmem>>, vector<1x16x1xf32>
      %24 = vector.shape_cast %23 : vector<1x16x1xf32> to vector<16x1xf32>
      %25 = vector.shape_cast %22 : vector<16x1xf32> to vector<1x16x1xf32>
      tpu.vector_store %arg6[%c0_19, %c0_20, %c0_21], %25 {strides = array<i32>} : memref<1x16x1xf32, #tpu.memory_space<vmem>>, vector<1x16x1xf32>,
    } else {
    }
    return
  }
  func.func @transform_0(%arg0: i32, %arg1: i32) -> (i32, i32) {
    %c0_i32 = arith.constant 0 : i32
    %c0_i32_0 = arith.constant 0 : i32
    return %c0_i32, %arg1 : i32, i32
  }
  func.func @transform_1(%arg0: i32, %arg1: i32) -> (i32, i32) {
    %c0_i32 = arith.constant 0 : i32
    return %arg1, %arg0 : i32, i32
  }
  func.func @transform_2(%arg0: i32, %arg1: i32) -> (i32, i32) {
    %c0_i32 = arith.constant 0 : i32
    %c0_i32_0 = arith.constant 0 : i32
    return %c0_i32, %arg0 : i32, i32
  }
  func.func @transform_3(%arg0: i32, %arg1: i32) -> (i32, i32, i32) {
    %c0_i32 = arith.constant 0 : i32
    %c0_i32_0 = arith.constant 0 : i32
    %c0_i32_1 = arith.constant 0 : i32
    return %arg0, %c0_i32, %c0_i32_0 : i32, i32, i32
  }
  func.func @transform_4(%arg0: i32, %arg1: i32) -> (i32, i32, i32) {
    %c0_i32 = arith.constant 0 : i32
    %c0_i32_0 = arith.constant 0 : i32
    %c0_i32_1 = arith.constant 0 : i32
    return %arg0, %c0_i32, %c0_i32_0 : i32, i32, i32
  }
}

module attributes {stable_mosaic.version = 11 : i64} {
  func.func @_convT_act_kernel(%arg0: i32, %arg1: i32, %arg2: memref<8x64xbf16, #tpu.memory_space<vmem>>, %arg3: memref<64x2048xbf16, #tpu.memory_space<vmem>>, %arg4: memref<8x2048xf32, #tpu.memory_space<vmem>>, %arg5: memref<8x2048xf32, #tpu.memory_space<vmem>>) attributes {dimension_semantics = [#tpu.dimension_semantics<parallel>, #tpu.dimension_semantics<arbitrary>], iteration_bounds = array<i64: 4, 1>, scalar_prefetch = 0 : i64, scratch_operands = 1 : i64, tpu.core_type = #tpu.core_type<tc>, window_params = [{transform_indices = @transform_0, window_bounds = array<i64: 8, 64>}, {transform_indices = @transform_1, window_bounds = array<i64: 64, 2048>}, {transform_indices = @transform_2, window_bounds = array<i64: 8, 2048>}]} {
    %c0_i32 = arith.constant 0 : i32
    %0 = arith.cmpi eq, %arg1, %c0_i32 : i32
    %1 = arith.extui %0 : i1 to i32
    %c0_i32_0 = arith.constant 0 : i32
    %2 = arith.cmpi ne, %1, %c0_i32_0 : i32
    scf.if %2 {
      %cst_10 = arith.constant 0.000000e+00 : f32
      %12 = vector.broadcast %cst_10 : f32 to vector<8x2048xf32>
      %c0_11 = arith.constant 0 : index
      %c0_12 = arith.constant 0 : index
      %13 = vector.load %arg5[%c0_11, %c0_12] : memref<8x2048xf32, #tpu.memory_space<vmem>>, vector<8x2048xf32>
      tpu.vector_store %arg5[%c0_11, %c0_12], %12 {strides = array<i32>} : memref<8x2048xf32, #tpu.memory_space<vmem>>, vector<8x2048xf32>,
    } else {
    }
    %c0 = arith.constant 0 : index
    %c0_1 = arith.constant 0 : index
    %3 = vector.load %arg5[%c0, %c0_1] : memref<8x2048xf32, #tpu.memory_space<vmem>>, vector<8x2048xf32>
    %c0_2 = arith.constant 0 : index
    %c0_3 = arith.constant 0 : index
    %4 = vector.load %arg2[%c0_2, %c0_3] : memref<8x64xbf16, #tpu.memory_space<vmem>>, vector<8x64xbf16>
    %c0_4 = arith.constant 0 : index
    %c0_5 = arith.constant 0 : index
    %5 = vector.load %arg3[%c0_4, %c0_5] : memref<64x2048xbf16, #tpu.memory_space<vmem>>, vector<64x2048xbf16>
    %cst = arith.constant dense<0.000000e+00> : vector<8x2048xf32>
    %6 = tpu.matmul %4, %5, %cst {dimension_numbers = #tpu.dot_dimension_numbers<[1], [0], [0], [1], [0, 0, 1, 1], [], []>} : vector<8x64xbf16>, vector<64x2048xbf16>, vector<8x2048xf32> -> vector<8x2048xf32>
    %7 = arith.addf %3, %6 : vector<8x2048xf32>
    %c0_6 = arith.constant 0 : index
    %c0_7 = arith.constant 0 : index
    %8 = vector.load %arg5[%c0_6, %c0_7] : memref<8x2048xf32, #tpu.memory_space<vmem>>, vector<8x2048xf32>
    tpu.vector_store %arg5[%c0_6, %c0_7], %7 {strides = array<i32>} : memref<8x2048xf32, #tpu.memory_space<vmem>>, vector<8x2048xf32>,
    %c0_i32_8 = arith.constant 0 : i32
    %9 = arith.cmpi eq, %arg1, %c0_i32_8 : i32
    %10 = arith.extui %9 : i1 to i32
    %c0_i32_9 = arith.constant 0 : i32
    %11 = arith.cmpi ne, %10, %c0_i32_9 : i32
    scf.if %11 {
      %c0_10 = arith.constant 0 : index
      %c0_11 = arith.constant 0 : index
      %12 = vector.load %arg5[%c0_10, %c0_11] : memref<8x2048xf32, #tpu.memory_space<vmem>>, vector<8x2048xf32>
      %13 = arith.negf %12 : vector<8x2048xf32>
      %14 = math.exp %13 : vector<8x2048xf32>
      %cst_12 = arith.constant 1.000000e+00 : f32
      %15 = vector.broadcast %cst_12 : f32 to vector<8x2048xf32>
      %16 = arith.addf %15, %14 : vector<8x2048xf32>
      %17 = arith.divf %15, %16 : vector<8x2048xf32>
      %c0_13 = arith.constant 0 : index
      %c0_14 = arith.constant 0 : index
      %18 = vector.load %arg4[%c0_13, %c0_14] : memref<8x2048xf32, #tpu.memory_space<vmem>>, vector<8x2048xf32>
      tpu.vector_store %arg4[%c0_13, %c0_14], %17 {strides = array<i32>} : memref<8x2048xf32, #tpu.memory_space<vmem>>, vector<8x2048xf32>,
    } else {
    }
    return
  }
  func.func @transform_0(%arg0: i32, %arg1: i32) -> (i32, i32) {
    %c0_i32 = arith.constant 0 : i32
    %c0_i32_0 = arith.constant 0 : i32
    return %c0_i32, %arg1 : i32, i32
  }
  func.func @transform_1(%arg0: i32, %arg1: i32) -> (i32, i32) {
    %c0_i32 = arith.constant 0 : i32
    return %arg1, %arg0 : i32, i32
  }
  func.func @transform_2(%arg0: i32, %arg1: i32) -> (i32, i32) {
    %c0_i32 = arith.constant 0 : i32
    %c0_i32_0 = arith.constant 0 : i32
    return %c0_i32, %arg0 : i32, i32
  }
}

</mosaic_0001>

<bundles_post_ra>
// kernel: generator_padding_forward.5
= control target key start
LH: loop header
LB: loop body
LE: loop exit
PB: predicated region body
PF: predicated region fallthrough
CT: control target
= control target key end

     0   :  { %7 = vsyncpa [#allocation3], 0  ;;  %s650_s9 = smov [#allocation2]   ;;  %s695_s0 = inlined_call_operand.vmem [shape: f32[8,17], index: 0, kind: input, shape index: {}]   ;;  %s696_s1 = inlined_call_operand.hbm [shape: f32[17,128], index: 1, kind: input, shape index: {}]   ;;  %s697_s2 = inlined_call_operand.vmem [shape: f32[8,128], index: 2, kind: output, shape index: {}]  }
   0x1   :  { %s15_s10 = sshll.u32 %s650_s9, 4  ;;  %s626_s13 = scalar_lea.hbm %s696_s1, 384  ;;  %s16_s10 = int_to_ptr.vmem [resolvable:$true] %s15_s10 }
   0x2   :  { %p627_p0 = scmp.ne.s32.totalorder %s696_s1, %s626_s13  ;;  %p630_p1 = scmp.lt.u32.totalorder %s626_s13, %s696_s1 }
   0x4   :  { %p632_p2 = pnand %p630_p1, %p627_p0 }
   0x6   :  { %635 = shalt.err (!%p632_p2)
}
   0x7   :  { %s636_s18 = scalar_lea.vmem %s16_s10, 384  ;;  %p641_p4 = scmp.lt.s32.totalorder %s16_s10, %s16_s10 }
   0x8   :  { %p637_p3 = scmp.ne.s32.totalorder %s16_s10, %s636_s18  ;;  %p642_p5 = scmp.lt.s32.totalorder %s636_s18, %s636_s18 }
   0xa   :  { %p643_p6 = por %p642_p5, %p641_p4 }
   0xc   :  { %p644_p7 = pnand %p643_p6, %p637_p3 }
   0xe   :  { %647 = shalt.err (!%p644_p7)
}
   0xf   :  { %s651_s19 = smov 128   ;;  %s652_s20 = smov 8  }
  0x10   :  { %21 = dma.hbm_to_vmem [thread:$0]  %s696_s1, 384, %s16_s10, [#allocation3], %s651_s19, %s651_s19, %s652_s20  }
  0x11   :  { %648 = dma.done.wait [#allocation3], 384  }
  0x12   :  { %649 = vsyncadd [#allocation3], 4294966912  ;;  %v653_v0 = vmov 0.0|0.0   ;;  %vm654_vm0 = vmmov 0   ;;  %v655_v1 = vmov 0.0   ;;  %vm33_vm1 = vcmask 1040384  }
  0x13   :  { %602 = vmatprep.subr.bf16.mxu0 %v653_v0  ;;  %593 = vmatprep.subr.bf16.mxu1 %v653_v0  ;;  %vm29_vm2 = vcmask 138240   ;;  %v26_v2 = vld [vmem:[#allocation2] sm:$0xff]  ;;  %v27_v3 = vld [vmem:[#allocation2 + $0x8] sm:$0xff]  ;;  %v28_v4 = vld [vmem:[#allocation2 + $0x10] sm:$0x1] }
  0x14   :  { %572 = vmatprep.mubr.msk.f32.mxu0 %vm654_vm0, %v655_v1  ;;  %545 = vmatprep.mubr.msk.f32.mxu1 %vm654_vm0, %v655_v1  ;;  %v38_v5 = vand.u32 4294901760, %v26_v2  ;;  %v41_v6 = vand.u32 4294901760, %v27_v3  ;;  %v35_v7 = vsel %vm33_vm1, %v28_v4, 0  ;;  %v25_v8 = vld [vmem:[%s695_s0] sm:$0xff] }
  0x15   :  { %v44_v9 = vand.u32 4294901760, %v35_v7  ;;  %v31_v10 = vsel %vm29_vm2, %v25_v8, 0 }
  0x16   :  { %v594_v11 = vpack.c.bf16 %v41_v6, %v38_v5  ;;  %v117_v12 = vsub.f32 %v26_v2, %v38_v5  ;;  %v124_v13 = vsub.f32 %v27_v3, %v41_v6  ;;  %v105_v14 = vand.u32 4294901760, %v31_v10 }
  0x17   :  { %v131_v15 = vsub.f32 %v35_v7, %v44_v9 }
  0x18   :  { %604 = vmatpush3.bf16.msra.mxu0 %v594_v11  ;;  %595 = vmatpush3.bf16.msra.mxu1 %v594_v11  ;;  %v106_v16 = vsub.f32 %v31_v10, %v105_v14  ;;  %v118_v17 = vand.u32 4294901760, %v117_v12  ;;  %v125_v18 = vand.u32 4294901760, %v124_v13  ;;  %v600_v31 = vpack.c.bf16 %v124_v13, %v117_v12 }
  0x19   :  { %570 = vmatprep.subr.mxu0 %v655_v1  ;;  %543 = vmatprep.subr.mxu1 %v655_v1  ;;  %v132_v19 = vand.u32 4294901760, %v131_v15 }
  0x1a   :  { %v107_v20 = vand.u32 4294901760, %v106_v16  ;;  %v119_v21 = vsub.f32 %v117_v12, %v118_v17  ;;  %v126_v22 = vsub.f32 %v124_v13, %v125_v18  ;;  %v606_v23 = vpack.c.bf16 %v125_v18, %v118_v17 }
  0x1b   :  { %v133_v27 = vsub.f32 %v131_v15, %v132_v19 }
  0x1c   :  { %571 = vmatpush3.msra.mxu0 %v44_v9  ;;  %544 = vmatpush3.msra.mxu1 %v44_v9  ;;  %v108_v24 = vsub.f32 %v106_v16, %v107_v20  ;;  %v120_v25 = vand.u32 4294901760, %v119_v21  ;;  %v127_v26 = vand.u32 4294901760, %v126_v22 }
  0x1d   :  { %573 = vmatmul.mubr.f32.vlgmr.msra.gmra.mrb[0].mxu0 %v107_v20  ;;  %596 = vmatprep.subr.bf16.mxu1 %v653_v0  ;;  %v134_v30 = vand.u32 4294901760, %v133_v27 }
  0x1e   :  { %v109_v28 = vand.u32 4294901760, %v108_v24  ;;  %605 = vmatprep.subr.bf16.mxu0 %v653_v0  ;;  %v597_v29 = vpack.c.bf16 %v127_v26, %v120_v25  ;;  %581 = vmatprep.mubr.msk.f32.mxu0 %vm654_vm0, %v655_v1 }
  0x1f   :  { %607 = vmatpush3.bf16.msra.mxu0 %v606_v23 }
  0x20   :  { %546 = vmatmul.mubr.f32.vlgmr.msra.gmra.mrb[0].mxu1 %v109_v28  ;;  %579 = vmatprep.subr.mxu0 %v655_v1 }
  0x21   :  { %598 = vmatpush3.bf16.msra.mxu1 %v597_v29  ;;  %554 = vmatprep.mubr.msk.f32.mxu1 %vm654_vm0, %v655_v1 }
  0x22   :  { %552 = vmatprep.subr.mxu1 %v655_v1 }
  0x23   :  { %580 = vmatpush3.msra.mxu0 %v132_v19 }
  0x24   :  { %608 = vmatprep.subr.bf16.mxu0 %v653_v0 }
  0x25   :  { %553 = vmatpush3.msra.mxu1 %v134_v30  ;;  %582 = vmatmul.mubr.f32.vlgmr.msra.gmra.mrb[0].mxu0 %v105_v14 }
  0x26   :  { %599 = vmatprep.subr.bf16.mxu1 %v653_v0  ;;  %610 = vmatpush3.bf16.msra.mxu0 %v594_v11 }
  0x27   :  { %588 = vmatprep.subr.mxu0 %v655_v1  ;;  %590 = vmatprep.mubr.msk.f32.mxu0 %vm654_vm0, %v655_v1 }
  0x28   :  { %555 = vmatmul.mubr.f32.vlgmr.msra.gmra.mrb[0].mxu1 %v105_v14 }
  0x29   :  { %601 = vmatpush3.bf16.msra.mxu1 %v600_v31  ;;  %563 = vmatprep.mubr.msk.f32.mxu1 %vm654_vm0, %v655_v1 }
  0x2a   :  { %561 = vmatprep.subr.mxu1 %v655_v1  ;;  %589 = vmatpush3.msra.mxu0 %v44_v9 }
  0x2d   :  { %562 = vmatpush3.msra.mxu1 %v131_v15  ;;  %591 = vmatmul.mubr.f32.vlgmr.msra.gmra.mrb[0].mxu0 %v105_v14 }
  0x30   :  { %564 = vmatmul.mubr.f32.vlgmr.msra.gmra.mrb[0].mxu1 %v106_v16 }
 0x100   :  { %v505_v32 = vpop.f32.mrb[0].mxu0 }
 0x101   :  { %v592_v33 = vpop.f32.mrb[1].mxu0 }
 0x103   :  { %v275_v34 = vpop.f32.mrb[0].mxu1 }
 0x104   :  { %v611_v35 = vadd.f32 %v505_v32, %v275_v34  ;;  %v565_v36 = vpop.f32.mrb[1].mxu1 }
 0x106   :  { %509 = vst [vmem:[%s697_s2] sm:$0xff] %v611_v35 }
 0x107   :  { %514 = vsyncpa [#allocation3], 1 }

// kernel: generator_padding_forward.6
= control target key start
LH: loop header
LB: loop body
LE: loop exit
PB: predicated region body
PF: predicated region fallthrough
CT: control target
= control target key end

     0   :  { %10 = vsyncpa [#allocation4], 0  ;;  %s842_s15 = smov [#allocation3]   ;;  %s1055_s0 = inlined_call_operand.hbm [shape: bf16[64,432], index: 0, kind: input, shape index: {}]   ;;  %s1056_s1 = inlined_call_operand.vmem [shape: bf16[432,128], index: 1, kind: input, shape index: {}]   ;;  %s1057_s2 = inlined_call_operand.vmem [shape: bf16[64,128], index: 2, kind: output, shape index: {0}]   ;;  %s1058_s3 = inlined_call_operand.vmem [shape: f32[1,64,1], index: 3, kind: output, shape index: {1}]   ;;  %s1059_s4 = inlined_call_operand.vmem [shape: f32[1,64,1], index: 4, kind: output, shape index: {2}]  }
   0x1   :  { %s16_s16 = sshll.u32 %s842_s15, 4  ;;  %s818_s19 = scalar_lea.hbm %s1055_s0, 2048  ;;  %s17_s16 = int_to_ptr.vmem [resolvable:$true] %s16_s16 }
   0x2   :  { %p819_p0 = scmp.ne.s32.totalorder %s1055_s0, %s818_s19  ;;  %p822_p1 = scmp.lt.u32.totalorder %s818_s19, %s1055_s0 }
   0x4   :  { %p824_p2 = pnand %p822_p1, %p819_p0 }
   0x6   :  { %827 = shalt.err (!%p824_p2)
}
   0x7   :  { %s828_s24 = scalar_lea.vmem %s17_s16, 2048  ;;  %p833_p4 = scmp.lt.s32.totalorder %s17_s16, %s17_s16 }
   0x8   :  { %p829_p3 = scmp.ne.s32.totalorder %s17_s16, %s828_s24  ;;  %p834_p5 = scmp.lt.s32.totalorder %s828_s24, %s828_s24 }
   0xa   :  { %p835_p6 = por %p834_p5, %p833_p4 }
   0xc   :  { %p836_p7 = pnand %p835_p6, %p829_p3 }
   0xe   :  { %839 = shalt.err (!%p836_p7)
}
   0xf   :  { %s843_s25 = smov 256   ;;  %s844_s26 = smov 16  }
  0x10   :  { %22 = dma.hbm_to_vmem [thread:$0]  %s1055_s0, 2048, %s17_s16, [#allocation4], %s843_s25, %s843_s25, %s844_s26  }
  0x11   :  { %840 = dma.done.wait [#allocation4], 2048  }
  0x12   :  { %841 = vsyncadd [#allocation4], 4294965248  ;;  %v845_v0 = vmov 0   ;;  %v767_v1 = vld [vmem:[%s1056_s1 + $0x80] sm:$0xff]   ;;  %v768_v2 = vld [vmem:[%s1056_s1 + $0x88] sm:$0xff]   ;;  %vm357_vm0 = vcmask 392192  }
  0x13   :  { %435 = vmatprep.subr.bf16.mxu1 %v845_v0  ;;  %v769_v3 = vld [vmem:[%s1056_s1 + $0x40] sm:$0xff]   ;;  %v771_v5 = vld [vmem:[%s1056_s1 + $0x90] sm:$0xff]   ;;  %v772_v6 = vld [vmem:[%s1056_s1 + $0x48] sm:$0xff]   ;;  %vm583_vm1 = vcmask 7168  }
  0x14   :  { %436 = vmatpush1.bf16.msra.mxu1 %v767_v1  ;;  %v770_v4 = vld [vmem:[%s1056_s1] sm:$0xff]   ;;  %723 = vmatprep.subr.bf16.mxu0 %v769_v3  ;;  %v773_v7 = vld [vmem:[%s1056_s1 + $0x8] sm:$0xff]   ;;  %v775_v8 = vld [vmem:[%s1056_s1 + $0x50] sm:$0xff]  }
  0x15   :  { %437 = vmatprep.subr.bf16.mxu1 %v845_v0  ;;  %724 = vmatpush3.bf16.msra.mxu0 %v770_v4  ;;  %v776_v9 = vld [vmem:[%s1056_s1 + $0x10] sm:$0xff]   ;;  %v774_v10 = vld [vmem:[%s1056_s1 + $0x98] sm:$0xff]   ;;  %v777_v12 = vld [vmem:[%s1056_s1 + $0xa0] sm:$0xff]  }
  0x16   :  { %725 = vmatprep.subr.bf16.mxu0 %v772_v6  ;;  %v778_v11 = vld [vmem:[%s1056_s1 + $0x58] sm:$0xff]   ;;  %v781_v14 = vld [vmem:[%s1056_s1 + $0x60] sm:$0xff]   ;;  %v780_v15 = vld [vmem:[%s1056_s1 + $0xa8] sm:$0xff]  }
  0x17   :  { %v779_v13 = vld [vmem:[%s1056_s1 + $0x18] sm:$0xff]   ;;  %v782_v16 = vld [vmem:[%s1056_s1 + $0x20] sm:$0xff]   ;;  %v784_v17 = vld [vmem:[%s1056_s1 + $0x68] sm:$0xff]  }
  0x18   :  { %438 = vmatpush1.bf16.msra.mxu1 %v768_v2  ;;  %v783_v18 = vld [vmem:[%s1056_s1 + $0xb0] sm:$0xff]   ;;  %v785_v19 = vld [vmem:[%s1056_s1 + $0x28] sm:$0xff]   ;;  %v786_v21 = vld [vmem:[%s1056_s1 + $0xb8] sm:$0xff]  }
  0x19   :  { %439 = vmatprep.subr.bf16.mxu1 %v845_v0  ;;  %726 = vmatpush3.bf16.msra.mxu0 %v773_v7  ;;  %v787_v20 = vld [vmem:[%s1056_s1 + $0x70] sm:$0xff]   ;;  %v790_v23 = vld [vmem:[%s1056_s1 + $0x78] sm:$0xff]   ;;  %v789_v27 = vld [vmem:[%s1056_s1 + $0xc0] sm:$0xff]  }
  0x1a   :  { %727 = vmatprep.subr.bf16.mxu0 %v775_v8  ;;  %v788_v22 = vld [vmem:[%s1056_s1 + $0x30] sm:$0xff]   ;;  %v791_v25 = vld [vmem:[%s1056_s1 + $0x38] sm:$0xff]   ;;  %v795_v30 = vld [vmem:[%s1056_s1 + $0xc8] sm:$0xff]  }
  0x1b   :  { %v794_v24 = vld [vmem:[#allocation3 + $0x4] ss:$16 sps:$4 sm:$0xff]   ;;  %v799_v26 = vld [vmem:[#allocation3 + $0xc] ss:$16 sps:$4 sm:$0xff]   ;;  %v792_v28 = vld [vmem:[#allocation3] ss:$16 sps:$4 sm:$0xff]  }
  0x1c   :  { %440 = vmatpush1.bf16.msra.mxu1 %v771_v5  ;;  %402 = vmatprep.mubr.bf16.mxu0 %v794_v24  ;;  %v800_v29 = vld [vmem:[#allocation3 + $0x24] ss:$16 sps:$4 sm:$0xff]   ;;  %v802_v32 = vld [vmem:[#allocation3 + $0x20] ss:$16 sps:$4 sm:$0xff]   ;;  %v797_v33 = vld [vmem:[#allocation3 + $0x8] ss:$16 sps:$4 sm:$0xff]  }
  0x1d   :  { %441 = vmatprep.subr.bf16.mxu1 %v845_v0  ;;  %728 = vmatpush3.bf16.msra.mxu0 %v776_v9  ;;  %v796_v31 = vld [vmem:[%s1056_s1 + $0xd0] sm:$0xff]   ;;  %v803_v35 = vld [vmem:[#allocation3 + $0x2c] ss:$16 sps:$4 sm:$0xff]   ;;  %v805_v37 = vld [vmem:[#allocation3 + $0x28] ss:$16 sps:$4 sm:$0xff]  }
  0x1e   :  { %729 = vmatprep.subr.bf16.mxu0 %v778_v11  ;;  %680 = vmatprep.mubr.msk.bf16.mxu1 %vm357_vm0, %v799_v26  ;;  %v806_v34 = vld [vmem:[#allocation3 + $0x44] ss:$16 sps:$4 sm:$0xff]   ;;  %v808_v36 = vld [vmem:[#allocation3 + $0x40] ss:$16 sps:$4 sm:$0xff]   ;;  %v809_v39 = vld [vmem:[#allocation3 + $0x4c] ss:$16 sps:$4 sm:$0xff]  }
  0x1f   :  { %v812_v38 = vld [vmem:[#allocation3 + $0x64] ss:$16 sps:$4 sm:$0xff]   ;;  %v814_v40 = vld [vmem:[#allocation3 + $0x60] ss:$16 sps:$4 sm:$0xff]   ;;  %v811_v41 = vld [vmem:[#allocation3 + $0x48] ss:$16 sps:$4 sm:$0xff]  }
  0x20   :  { %442 = vmatpush1.bf16.msra.mxu1 %v774_v10  ;;  %v815_v42 = vld [vmem:[#allocation3 + $0x6c] ss:$16 sps:$4 sm:$0xff]   ;;  %v817_v43 = vld [vmem:[#allocation3 + $0x68] ss:$16 sps:$4 sm:$0xff]  }
  0x21   :  { %443 = vmatprep.subr.bf16.mxu1 %v845_v0  ;;  %730 = vmatpush3.bf16.msra.mxu0 %v779_v13 }
  0x22   :  { %731 = vmatprep.subr.bf16.mxu0 %v781_v14 }
  0x24   :  { %444 = vmatpush1.bf16.msra.mxu1 %v777_v12 }
  0x25   :  { %445 = vmatprep.subr.bf16.mxu1 %v845_v0  ;;  %732 = vmatpush3.bf16.msra.mxu0 %v782_v16 }
  0x26   :  { %733 = vmatprep.subr.bf16.mxu0 %v784_v17 }
  0x28   :  { %446 = vmatpush1.bf16.msra.mxu1 %v780_v15 }
  0x29   :  { %447 = vmatprep.subr.bf16.mxu1 %v845_v0  ;;  %734 = vmatpush3.bf16.msra.mxu0 %v785_v19 }
  0x2a   :  { %735 = vmatprep.subr.bf16.mxu0 %v787_v20 }
  0x2c   :  { %448 = vmatpush1.bf16.msra.mxu1 %v783_v18 }
  0x2d   :  { %449 = vmatprep.subr.bf16.mxu1 %v845_v0  ;;  %736 = vmatpush3.bf16.msra.mxu0 %v788_v22 }
  0x2e   :  { %737 = vmatprep.subr.bf16.mxu0 %v790_v23 }
  0x30   :  { %450 = vmatpush1.bf16.msra.mxu1 %v786_v21 }
  0x31   :  { %451 = vmatprep.subr.bf16.mxu1 %v845_v0  ;;  %738 = vmatpush3.bf16.msra.mxu0 %v791_v25 }
  0x34   :  { %452 = vmatpush1.bf16.msra.mxu1 %v789_v27  ;;  %403 = vmatmul.mubr.bf16.vlgmr.msra.gmra.mrb[0].mxu0 %v792_v28 }
  0x35   :  { %453 = vmatprep.subr.bf16.mxu1 %v845_v0  ;;  %410 = vmatprep.mubr.bf16.mxu0 %v800_v29 }
  0x38   :  { %454 = vmatpush1.bf16.msra.mxu1 %v795_v30 }
  0x39   :  { %455 = vmatprep.subr.bf16.mxu1 %v845_v0 }
  0x3c   :  { %456 = vmatpush1.bf16.msra.mxu1 %v796_v31  ;;  %411 = vmatmul.mubr.bf16.gmra.mrb[4].mxu0 %v802_v32 }
  0x3d   :  { %418 = vmatprep.mubr.bf16.mxu0 %v806_v34 }
  0x3f   :  { %468 = vmatmul.mubr.bf16.vlgmr.msra.gmra.mrb[0].mxu1 %v797_v33 }
  0x40   :  { %681 = vmatprep.mubr.msk.bf16.mxu1 %vm357_vm0, %v803_v35 }
  0x44   :  { %419 = vmatmul.mubr.bf16.gmra.mrb[8].mxu0 %v808_v36 }
  0x45   :  { %426 = vmatprep.mubr.bf16.mxu0 %v812_v38 }
  0x47   :  { %476 = vmatmul.mubr.bf16.gmra.mrb[4].mxu1 %v805_v37 }
  0x48   :  { %682 = vmatprep.mubr.msk.bf16.mxu1 %vm357_vm0, %v809_v39 }
  0x4c   :  { %427 = vmatmul.mubr.bf16.gmra.mrb[12].mxu0 %v814_v40 }
  0x4f   :  { %484 = vmatmul.mubr.bf16.gmra.mrb[8].mxu1 %v811_v41 }
  0x50   :  { %683 = vmatprep.mubr.msk.bf16.mxu1 %vm357_vm0, %v815_v42 }
  0x57   :  { %492 = vmatmul.mubr.bf16.gmra.mrb[12].mxu1 %v817_v43 }
 0x107   :  { %v739_v44 = vpop.f32.mrb[0].mxu0 }
 0x108   :  { %v740_v45 = vpop.f32.mrb[1].mxu0 }
 0x109   :  { %v741_v46 = vadd.f32 %v740_v45, %v739_v44  ;;  %v742_v47 = vpop.f32.mrb[2].mxu0 }
 0x10a   :  { %v743_v48 = vpop.f32.mrb[3].mxu0 }
 0x10b   :  { %v744_v49 = vadd.f32 %v743_v48, %v742_v47 }
 0x10f   :  { %v745_v50 = vpop.f32.mrb[4].mxu0 }
 0x110   :  { %v746_v52 = vpop.f32.mrb[5].mxu0 }
 0x111   :  { %v747_v55 = vadd.f32 %v746_v52, %v745_v50  ;;  %v748_v56 = vpop.f32.mrb[6].mxu0 }
 0x112   :  { %v469_v51 = vpop.f32.mrb[0].mxu1  ;;  %v749_v58 = vpop.f32.mrb[7].mxu0 }
 0x113   :  { %v470_v53 = vadd.f32 %v741_v46, %v469_v51  ;;  %v471_v54 = vpop.f32.mrb[1].mxu1  ;;  %v750_v61 = vadd.f32 %v749_v58, %v748_v56 }
 0x114   :  { %v472_v57 = vpop.f32.mrb[2].mxu1 }
 0x115   :  { %v473_v59 = vadd.f32 %v744_v49, %v472_v57  ;;  %v474_v60 = vpop.f32.mrb[3].mxu1  ;;  %567 = vadd.xlane.f32.xlu0 %v470_v53  ;;  %v592_v5 = vmul.f32 %v470_v53, %v470_v53 }
 0x117   :  { %v703_v62 = vpack.c.bf16 %v473_v59, %v470_v53  ;;  %v593_v63 = vmul.f32 %v473_v59, %v473_v59  ;;  %v751_v0 = vpop.f32.mrb[8].mxu0 }
 0x118   :  { %v752_v2 = vpop.f32.mrb[9].mxu0 }
 0x119   :  { %704 = vst [vmem:[%s1057_s2] sm:$0xff] %v703_v62   ;;  %602 = vadd.xlane.f32.xlu1 %v593_v63  ;;  %569 = vadd.xlane.f32.xlu0 %v473_v59  ;;  %v753_v6 = vadd.f32 %v752_v2, %v751_v0  ;;  %v754_v7 = vpop.f32.mrb[10].mxu0 }
 0x11a   :  { %v477_v1 = vpop.f32.mrb[4].mxu1  ;;  %v755_v9 = vpop.f32.mrb[11].mxu0 }
 0x11b   :  { %v478_v3 = vadd.f32 %v747_v55, %v477_v1  ;;  %v479_v4 = vpop.f32.mrb[5].mxu1  ;;  %v756_v12 = vadd.f32 %v755_v9, %v754_v7 }
 0x11c   :  { %v480_v8 = vpop.f32.mrb[6].mxu1 }
 0x11d   :  { %v481_v10 = vadd.f32 %v750_v61, %v480_v8  ;;  %v482_v11 = vpop.f32.mrb[7].mxu1  ;;  %571 = vadd.xlane.f32.xlu1 %v478_v3  ;;  %600 = vadd.xlane.f32.xlu0 %v592_v5  ;;  %v594_v14 = vmul.f32 %v478_v3, %v478_v3 }
 0x11f   :  { %v708_v13 = vpack.c.bf16 %v481_v10, %v478_v3  ;;  %v757_v15 = vpop.f32.mrb[12].mxu0  ;;  %v595_v20 = vmul.f32 %v481_v10, %v481_v10 }
 0x120   :  { %v758_v17 = vpop.f32.mrb[13].mxu0 }
 0x121   :  { %720 = vst [vmem:[%s1057_s2 + $0x8] sm:$0xff] %v708_v13   ;;  %573 = vadd.xlane.f32.xlu1 %v481_v10  ;;  %604 = vadd.xlane.f32.xlu0 %v594_v14  ;;  %v759_v21 = vadd.f32 %v758_v17, %v757_v15  ;;  %v760_v22 = vpop.f32.mrb[14].mxu0 }
 0x122   :  { %v485_v16 = vpop.f32.mrb[8].mxu1  ;;  %v761_v24 = vpop.f32.mrb[15].mxu0 }
 0x123   :  { %v486_v18 = vadd.f32 %v753_v6, %v485_v16  ;;  %v487_v19 = vpop.f32.mrb[9].mxu1  ;;  %v762_v27 = vadd.f32 %v761_v24, %v760_v22 }
 0x124   :  { %v488_v23 = vpop.f32.mrb[10].mxu1 }
 0x125   :  { %v489_v25 = vadd.f32 %v756_v12, %v488_v23  ;;  %v490_v26 = vpop.f32.mrb[11].mxu1  ;;  %606 = vadd.xlane.f32.xlu1 %v595_v20  ;;  %575 = vadd.xlane.f32.xlu0 %v486_v18  ;;  %v596_v28 = vmul.f32 %v486_v18, %v486_v18 }
 0x127   :  { %v713_v29 = vpack.c.bf16 %v489_v25, %v486_v18  ;;  %v597_v33 = vmul.f32 %v489_v25, %v489_v25 }
 0x129   :  { %721 = vst [vmem:[%s1057_s2 + $0x10] sm:$0xff] %v713_v29   ;;  %577 = vadd.xlane.f32.xlu1 %v489_v25  ;;  %608 = vadd.xlane.f32.xlu0 %v596_v28 }
 0x12a   :  { %v493_v30 = vpop.f32.mrb[12].mxu1 }
 0x12b   :  { %v494_v31 = vadd.f32 %v759_v21, %v493_v30  ;;  %v495_v32 = vpop.f32.mrb[13].mxu1 }
 0x12c   :  { %v496_v34 = vpop.f32.mrb[14].mxu1 }
 0x12d   :  { %v497_v35 = vadd.f32 %v762_v27, %v496_v34  ;;  %v498_v36 = vpop.f32.mrb[15].mxu1  ;;  %610 = vadd.xlane.f32.xlu1 %v597_v33  ;;  %579 = vadd.xlane.f32.xlu0 %v494_v31  ;;  %v598_v37 = vmul.f32 %v494_v31, %v494_v31 }
 0x12f   :  { %v718_v38 = vpack.c.bf16 %v497_v35, %v494_v31  ;;  %v599_v39 = vmul.f32 %v497_v35, %v497_v35 }
 0x131   :  { %722 = vst [vmem:[%s1057_s2 + $0x18] sm:$0xff] %v718_v38   ;;  %581 = vadd.xlane.f32.xlu1 %v497_v35  ;;  %612 = vadd.xlane.f32.xlu0 %v598_v37 }
 0x135   :  { %614 = vadd.xlane.f32.xlu1 %v599_v39 }
 0x1a2   :  { %v568_v40 = vpop.xlane.xlu0 %567 }
 0x1a3   :  { %584 = vst.msk [vmem:[%s1058_s3] sm:$0xff] %vm583_vm1, %v568_v40 }
 0x1a6   :  { %v603_v41 = vpop.xlane.xlu1 %602  ;;  %v570_v42 = vpop.xlane.xlu0 %569 }
 0x1a7   :  { %617 = vst.msk [vmem:[%s1059_s4 + $0x8] sm:$0xff] %vm583_vm1, %v603_v41  ;;  %585 = vst.msk [vmem:[%s1058_s3 + $0x8] sm:$0xff] %vm583_vm1, %v570_v42 }
 0x1aa   :  { %v572_v43 = vpop.xlane.xlu1 %571  ;;  %v601_v44 = vpop.xlane.xlu0 %600 }
 0x1ab   :  { %586 = vst.msk [vmem:[%s1058_s3 + $0x10] sm:$0xff] %vm583_vm1, %v572_v43  ;;  %616 = vst.msk [vmem:[%s1059_s4] sm:$0xff] %vm583_vm1, %v601_v44 }
 0x1ae   :  { %v574_v45 = vpop.xlane.xlu1 %573  ;;  %v605_v46 = vpop.xlane.xlu0 %604 }
 0x1af   :  { %587 = vst.msk [vmem:[%s1058_s3 + $0x18] sm:$0xff] %vm583_vm1, %v574_v45  ;;  %618 = vst.msk [vmem:[%s1059_s4 + $0x10] sm:$0xff] %vm583_vm1, %v605_v46 }
 0x1b2   :  { %v607_v47 = vpop.xlane.xlu1 %606  ;;  %v576_v48 = vpop.xlane.xlu0 %575 }
 0x1b3   :  { %619 = vst.msk [vmem:[%s1059_s4 + $0x18] sm:$0xff] %vm583_vm1, %v607_v47  ;;  %588 = vst.msk [vmem:[%s1058_s3 + $0x20] sm:$0xff] %vm583_vm1, %v576_v48 }
 0x1b6   :  { %v578_v49 = vpop.xlane.xlu1 %577  ;;  %v609_v50 = vpop.xlane.xlu0 %608 }
 0x1b7   :  { %589 = vst.msk [vmem:[%s1058_s3 + $0x28] sm:$0xff] %vm583_vm1, %v578_v49  ;;  %620 = vst.msk [vmem:[%s1059_s4 + $0x20] sm:$0xff] %vm583_vm1, %v609_v50 }
 0x1ba   :  { %v611_v51 = vpop.xlane.xlu1 %610  ;;  %v580_v52 = vpop.xlane.xlu0 %579 }
 0x1bb   :  { %621 = vst.msk [vmem:[%s1059_s4 + $0x28] sm:$0xff] %vm583_vm1, %v611_v51  ;;  %590 = vst.msk [vmem:[%s1058_s3 + $0x30] sm:$0xff] %vm583_vm1, %v580_v52 }
 0x1be   :  { %v582_v53 = vpop.xlane.xlu1 %581  ;;  %v613_v54 = vpop.xlane.xlu0 %612 }
 0x1bf   :  { %591 = vst.msk [vmem:[%s1058_s3 + $0x38] sm:$0xff] %vm583_vm1, %v582_v53  ;;  %622 = vst.msk [vmem:[%s1059_s4 + $0x30] sm:$0xff] %vm583_vm1, %v613_v54 }
 0x1c2   :  { %v615_v55 = vpop.xlane.xlu1 %614 }
 0x1c3   :  { %623 = vst.msk [vmem:[%s1059_s4 + $0x38] sm:$0xff] %vm583_vm1, %v615_v55 }
 0x1c4   :  { %636 = vsyncpa [#allocation4], 1 }

// kernel: generator_padding_forward.7
= control target key start
LH: loop header
LB: loop body
LE: loop exit
PB: predicated region body
PF: predicated region fallthrough
CT: control target
= control target key end

     0   :  { %v381_v0 = vmov 0   ;;  %vm161_vm0 = vcmask 785408   ;;  %vm260_vm1 = vcmask 7168   ;;  %s527_s1 = inlined_call_operand.vmem [shape: bf16[224,128], index: 1, kind: input, shape index: {}]   ;;  %s528_s0 = inlined_call_operand.vmem [shape: bf16[32,224], index: 0, kind: input, shape index: {}]   ;;  %s529_s2 = inlined_call_operand.vmem [shape: bf16[32,128], index: 2, kind: output, shape index: {0}]   ;;  %s530_s3 = inlined_call_operand.vmem [shape: f32[1,32,1], index: 3, kind: output, shape index: {1}]   ;;  %s531_s4 = inlined_call_operand.vmem [shape: f32[1,32,1], index: 4, kind: output, shape index: {2}]  }
   0x1   :  { %168 = vmatprep.subr.bf16.mxu0 %v381_v0  ;;  %332 = vmatprep.subr.bf16.mxu1 %v381_v0  ;;  %v361_v1 = vld [vmem:[%s527_s1] sm:$0xff]   ;;  %v362_v2 = vld [vmem:[%s527_s1 + $0x8] sm:$0xff]   ;;  %v363_v3 = vld [vmem:[%s527_s1 + $0x10] sm:$0xff]  }
   0x2   :  { %169 = vmatpush1.bf16.msra.mxu0 %v361_v1  ;;  %346 = vmatpush1.bf16.msra.mxu1 %v361_v1  ;;  %v364_v4 = vld [vmem:[%s527_s1 + $0x18] sm:$0xff]   ;;  %v365_v5 = vld [vmem:[%s527_s1 + $0x20] sm:$0xff]   ;;  %v366_v8 = vld [vmem:[%s527_s1 + $0x28] sm:$0xff]  }
   0x3   :  { %170 = vmatprep.subr.bf16.mxu0 %v381_v0  ;;  %333 = vmatprep.subr.bf16.mxu1 %v381_v0  ;;  %v377_v6 = vld [vmem:[%s528_s0 + $0x4] ss:$8 sps:$4 sm:$0xff]   ;;  %v380_v7 = vld [vmem:[%s528_s0 + $0x14] ss:$8 sps:$4 sm:$0xff]   ;;  %v375_v17 = vld [vmem:[%s528_s0] ss:$8 sps:$4 sm:$0xff]  }
   0x4   :  { %311 = vmatprep.mubr.msk.bf16.mxu0 %vm161_vm0, %v377_v6  ;;  %312 = vmatprep.mubr.msk.bf16.mxu1 %vm161_vm0, %v380_v7  ;;  %v367_v9 = vld [vmem:[%s527_s1 + $0x30] sm:$0xff]   ;;  %v368_v10 = vld [vmem:[%s527_s1 + $0x38] sm:$0xff]   ;;  %v369_v11 = vld [vmem:[%s527_s1 + $0x40] sm:$0xff]  }
   0x5   :  { %v370_v12 = vld [vmem:[%s527_s1 + $0x48] sm:$0xff]   ;;  %v371_v13 = vld [vmem:[%s527_s1 + $0x50] sm:$0xff]   ;;  %v372_v14 = vld [vmem:[%s527_s1 + $0x58] sm:$0xff]  }
   0x6   :  { %171 = vmatpush1.bf16.msra.mxu0 %v362_v2  ;;  %347 = vmatpush1.bf16.msra.mxu1 %v362_v2  ;;  %v373_v15 = vld [vmem:[%s527_s1 + $0x60] sm:$0xff]   ;;  %v374_v16 = vld [vmem:[%s527_s1 + $0x68] sm:$0xff]   ;;  %v378_v18 = vld [vmem:[%s528_s0 + $0x10] ss:$8 sps:$4 sm:$0xff]  }
   0x7   :  { %172 = vmatprep.subr.bf16.mxu0 %v381_v0  ;;  %334 = vmatprep.subr.bf16.mxu1 %v381_v0 }
   0xa   :  { %173 = vmatpush1.bf16.msra.mxu0 %v363_v3  ;;  %348 = vmatpush1.bf16.msra.mxu1 %v363_v3 }
   0xb   :  { %174 = vmatprep.subr.bf16.mxu0 %v381_v0  ;;  %335 = vmatprep.subr.bf16.mxu1 %v381_v0 }
   0xe   :  { %175 = vmatpush1.bf16.msra.mxu0 %v364_v4  ;;  %349 = vmatpush1.bf16.msra.mxu1 %v364_v4 }
   0xf   :  { %176 = vmatprep.subr.bf16.mxu0 %v381_v0  ;;  %336 = vmatprep.subr.bf16.mxu1 %v381_v0 }
  0x12   :  { %177 = vmatpush1.bf16.msra.mxu0 %v365_v5  ;;  %350 = vmatpush1.bf16.msra.mxu1 %v365_v5 }
  0x13   :  { %178 = vmatprep.subr.bf16.mxu0 %v381_v0  ;;  %337 = vmatprep.subr.bf16.mxu1 %v381_v0 }
  0x16   :  { %179 = vmatpush1.bf16.msra.mxu0 %v366_v8  ;;  %351 = vmatpush1.bf16.msra.mxu1 %v366_v8 }
  0x17   :  { %180 = vmatprep.subr.bf16.mxu0 %v381_v0  ;;  %338 = vmatprep.subr.bf16.mxu1 %v381_v0 }
  0x1a   :  { %181 = vmatpush1.bf16.msra.mxu0 %v367_v9  ;;  %352 = vmatpush1.bf16.msra.mxu1 %v367_v9 }
  0x1b   :  { %182 = vmatprep.subr.bf16.mxu0 %v381_v0  ;;  %339 = vmatprep.subr.bf16.mxu1 %v381_v0 }
  0x1e   :  { %183 = vmatpush1.bf16.msra.mxu0 %v368_v10  ;;  %353 = vmatpush1.bf16.msra.mxu1 %v368_v10 }
  0x1f   :  { %184 = vmatprep.subr.bf16.mxu0 %v381_v0  ;;  %340 = vmatprep.subr.bf16.mxu1 %v381_v0 }
  0x22   :  { %185 = vmatpush1.bf16.msra.mxu0 %v369_v11  ;;  %354 = vmatpush1.bf16.msra.mxu1 %v369_v11 }
  0x23   :  { %186 = vmatprep.subr.bf16.mxu0 %v381_v0  ;;  %341 = vmatprep.subr.bf16.mxu1 %v381_v0 }
  0x26   :  { %187 = vmatpush1.bf16.msra.mxu0 %v370_v12  ;;  %355 = vmatpush1.bf16.msra.mxu1 %v370_v12 }
  0x27   :  { %188 = vmatprep.subr.bf16.mxu0 %v381_v0  ;;  %342 = vmatprep.subr.bf16.mxu1 %v381_v0 }
  0x2a   :  { %189 = vmatpush1.bf16.msra.mxu0 %v371_v13  ;;  %356 = vmatpush1.bf16.msra.mxu1 %v371_v13 }
  0x2b   :  { %190 = vmatprep.subr.bf16.mxu0 %v381_v0  ;;  %343 = vmatprep.subr.bf16.mxu1 %v381_v0 }
  0x2e   :  { %191 = vmatpush1.bf16.msra.mxu0 %v372_v14  ;;  %357 = vmatpush1.bf16.msra.mxu1 %v372_v14 }
  0x2f   :  { %192 = vmatprep.subr.bf16.mxu0 %v381_v0  ;;  %344 = vmatprep.subr.bf16.mxu1 %v381_v0 }
  0x32   :  { %193 = vmatpush1.bf16.msra.mxu0 %v373_v15  ;;  %358 = vmatpush1.bf16.msra.mxu1 %v373_v15 }
  0x33   :  { %194 = vmatprep.subr.bf16.mxu0 %v381_v0  ;;  %345 = vmatprep.subr.bf16.mxu1 %v381_v0 }
  0x36   :  { %195 = vmatpush1.bf16.msra.mxu0 %v374_v16  ;;  %359 = vmatpush1.bf16.msra.mxu1 %v374_v16 }
  0x39   :  { %201 = vmatmul.mubr.bf16.vlgmr.msra.gmra.mrb[0].mxu0 %v375_v17  ;;  %209 = vmatmul.mubr.bf16.vlgmr.msra.gmra.mrb[0].mxu1 %v378_v18 }
 0x10c   :  { %v202_v19 = vpop.f32.mrb[0].mxu0  ;;  %v210_v20 = vpop.f32.mrb[0].mxu1 }
 0x10d   :  { %256 = vadd.xlane.f32.xlu1 %v210_v20  ;;  %v212_v21 = vpop.f32.mrb[1].mxu1  ;;  %252 = vadd.xlane.f32.xlu0 %v202_v19  ;;  %v204_v22 = vpop.f32.mrb[1].mxu0  ;;  %v265_v29 = vmul.f32 %v202_v19, %v202_v19  ;;  %v267_v31 = vmul.f32 %v210_v20, %v210_v20 }
 0x10e   :  { %v205_v23 = vpop.f32.mrb[2].mxu0  ;;  %v213_v24 = vpop.f32.mrb[2].mxu1 }
 0x10f   :  { %v324_v25 = vpack.c.bf16 %v205_v23, %v202_v19  ;;  %v329_v26 = vpack.c.bf16 %v213_v24, %v210_v20  ;;  %v207_v27 = vpop.f32.mrb[3].mxu0  ;;  %v215_v28 = vpop.f32.mrb[3].mxu1  ;;  %v266_v30 = vmul.f32 %v205_v23, %v205_v23  ;;  %v268_v32 = vmul.f32 %v213_v24, %v213_v24 }
 0x111   :  { %325 = vst [vmem:[%s529_s2] sm:$0xff] %v324_v25   ;;  %331 = vst [vmem:[%s529_s2 + $0x8] sm:$0xff] %v329_v26   ;;  %258 = vadd.xlane.f32.xlu1 %v213_v24  ;;  %254 = vadd.xlane.f32.xlu0 %v205_v23 }
 0x115   :  { %269 = vadd.xlane.f32.xlu0 %v265_v29  ;;  %271 = vadd.xlane.f32.xlu1 %v266_v30 }
 0x119   :  { %273 = vadd.xlane.f32.xlu0 %v267_v31  ;;  %275 = vadd.xlane.f32.xlu1 %v268_v32 }
 0x19a   :  { %v257_v33 = vpop.xlane.xlu1 %256  ;;  %v253_v34 = vpop.xlane.xlu0 %252 }
 0x19b   :  { %263 = vst.msk [vmem:[%s530_s3 + $0x10] sm:$0xff] %vm260_vm1, %v257_v33  ;;  %261 = vst.msk [vmem:[%s530_s3] sm:$0xff] %vm260_vm1, %v253_v34 }
 0x19e   :  { %v259_v35 = vpop.xlane.xlu1 %258  ;;  %v255_v36 = vpop.xlane.xlu0 %254 }
 0x19f   :  { %264 = vst.msk [vmem:[%s530_s3 + $0x18] sm:$0xff] %vm260_vm1, %v259_v35  ;;  %262 = vst.msk [vmem:[%s530_s3 + $0x8] sm:$0xff] %vm260_vm1, %v255_v36 }
 0x1a2   :  { %v270_v37 = vpop.xlane.xlu0 %269  ;;  %v272_v38 = vpop.xlane.xlu1 %271 }
 0x1a3   :  { %277 = vst.msk [vmem:[%s531_s4] sm:$0xff] %vm260_vm1, %v270_v37  ;;  %278 = vst.msk [vmem:[%s531_s4 + $0x8] sm:$0xff] %vm260_vm1, %v272_v38 }
 0x1a6   :  { %v274_v39 = vpop.xlane.xlu0 %273  ;;  %v276_v40 = vpop.xlane.xlu1 %275 }
 0x1a7   :  { %279 = vst.msk [vmem:[%s531_s4 + $0x10] sm:$0xff] %vm260_vm1, %v274_v39  ;;  %280 = vst.msk [vmem:[%s531_s4 + $0x18] sm:$0xff] %vm260_vm1, %v276_v40 }

// kernel: generator_padding_forward.8
= control target key start
LH: loop header
LB: loop body
LE: loop exit
PB: predicated region body
PF: predicated region fallthrough
CT: control target
= control target key end

     0   :  { %v825_v3 = vmov 0   ;;  %vm394_vm0 = vcmask 916480   ;;  %vm695_vm1 = vcmask 7168   ;;  %s1072_s1 = inlined_call_operand.vmem [shape: bf16[112,1024], index: 1, kind: input, shape index: {}]   ;;  %s1073_s0 = inlined_call_operand.vmem [shape: bf16[16,112], index: 0, kind: input, shape index: {}]   ;;  %s1074_s2 = inlined_call_operand.vmem [shape: bf16[16,1024], index: 2, kind: output, shape index: {0}]   ;;  %s1075_s3 = inlined_call_operand.vmem [shape: f32[1,16,1], index: 3, kind: output, shape index: {1}]   ;;  %s1076_s4 = inlined_call_operand.vmem [shape: f32[1,16,1], index: 4, kind: output, shape index: {2}]  }
   0x1   :  { %v53_v0 = vld [vmem:[%s1072_s1] sm:$0xff]  ;;  %v54_v2 = vld [vmem:[%s1072_s1 + $0x8] sm:$0xff]  ;;  %430 = vmatprep.mubr.bf16.mxu0 %v825_v3  ;;  %473 = vmatprep.mubr.bf16.mxu1 %v825_v3  ;;  %v55_v55 = vld [vmem:[%s1072_s1 + $0x10] sm:$0xff] }
   0x2   :  { %v57_v1 = vld [vmem:[%s1072_s1 + $0x20] sm:$0xff]  ;;  %v58_v6 = vld [vmem:[%s1072_s1 + $0x28] sm:$0xff]  ;;  %v59_v56 = vld [vmem:[%s1072_s1 + $0x30] sm:$0xff] }
   0x3   :  { %v748_v4 = vcombine.high %v53_v0, %v57_v1  ;;  %v747_v5 = vcombine.low %v53_v0, %v57_v1  ;;  %v61_v7 = vld [vmem:[%s1072_s1 + $0x40] sm:$0xff]  ;;  %v750_v9 = vcombine.high %v54_v2, %v58_v6  ;;  %v749_v10 = vcombine.low %v54_v2, %v58_v6  ;;  %v62_v12 = vld [vmem:[%s1072_s1 + $0x48] sm:$0xff]  ;;  %v56_v57 = vld [vmem:[%s1072_s1 + $0x18] sm:$0xff] }
   0x4   :  { %v65_v8 = vld [vmem:[%s1072_s1 + $0x60] sm:$0xff]  ;;  %v66_v13 = vld [vmem:[%s1072_s1 + $0x68] sm:$0xff]  ;;  %v60_v58 = vld [vmem:[%s1072_s1 + $0x38] sm:$0xff]  ;;  %v752_v61 = vcombine.high %v55_v55, %v59_v56 }
   0x5   :  { %v756_v11 = vcombine.high %v61_v7, %v65_v8  ;;  %v69_v14 = vld [vmem:[%s1072_s1 + $0x80] sm:$0xff]  ;;  %398 = vmatprep.subr.bf16.mxu0 %v748_v4  ;;  %v758_v15 = vcombine.high %v62_v12, %v66_v13  ;;  %v70_v17 = vld [vmem:[%s1072_s1 + $0x88] sm:$0xff]  ;;  %441 = vmatprep.subr.bf16.mxu1 %v750_v9  ;;  %v755_v19 = vcombine.low %v61_v7, %v65_v8  ;;  %v63_v63 = vld [vmem:[%s1072_s1 + $0x50] sm:$0xff] }
   0x6   :  { %v73_v16 = vld [vmem:[%s1072_s1 + $0xa0] sm:$0xff]  ;;  %v74_v18 = vld [vmem:[%s1072_s1 + $0xa8] sm:$0xff]  ;;  %399 = vmatpush1.bf16.msra.mxu0 %v747_v5  ;;  %442 = vmatpush1.bf16.msra.mxu1 %v749_v10  ;;  %v757_v20 = vcombine.low %v62_v12, %v66_v13  ;;  %v754_v62 = vcombine.high %v56_v57, %v60_v58  ;;  %v67_v0 = vld [vmem:[%s1072_s1 + $0x70] sm:$0xff]  ;;  %v751_v5 = vcombine.low %v55_v55, %v59_v56 }
   0x7   :  { %400 = vmatprep.subr.bf16.mxu0 %v756_v11  ;;  %v764_v21 = vcombine.high %v69_v14, %v73_v16  ;;  %443 = vmatprep.subr.bf16.mxu1 %v758_v15  ;;  %v766_v22 = vcombine.high %v70_v17, %v74_v18  ;;  %v77_v23 = vld [vmem:[%s1072_s1 + $0xc0] sm:$0xff]  ;;  %v78_v25 = vld [vmem:[%s1072_s1 + $0xc8] sm:$0xff]  ;;  %v763_v27 = vcombine.low %v69_v14, %v73_v16  ;;  %v64_v2 = vld [vmem:[%s1072_s1 + $0x58] sm:$0xff] }
   0x8   :  { %v81_v24 = vld [vmem:[%s1072_s1 + $0xe0] sm:$0xff]  ;;  %v82_v26 = vld [vmem:[%s1072_s1 + $0xe8] sm:$0xff]  ;;  %v765_v28 = vcombine.low %v70_v17, %v74_v18  ;;  %v68_v4 = vld [vmem:[%s1072_s1 + $0x78] sm:$0xff]  ;;  %v753_v6 = vcombine.low %v56_v57, %v60_v58  ;;  %v760_v7 = vcombine.high %v63_v63, %v67_v0  ;;  %v759_v13 = vcombine.low %v63_v63, %v67_v0 }
   0x9   :  { %v772_v29 = vcombine.high %v77_v23, %v81_v24  ;;  %v774_v30 = vcombine.high %v78_v25, %v82_v26  ;;  %v85_v31 = vld [vmem:[%s1072_s1 + $0x100] sm:$0xff]  ;;  %v86_v33 = vld [vmem:[%s1072_s1 + $0x108] sm:$0xff]  ;;  %v771_v35 = vcombine.low %v77_v23, %v81_v24  ;;  %v773_v36 = vcombine.low %v78_v25, %v82_v26  ;;  %v71_v9 = vld [vmem:[%s1072_s1 + $0x90] sm:$0xff] }
   0xa   :  { %401 = vmatpush1.bf16.msra.mxu0 %v755_v19  ;;  %444 = vmatpush1.bf16.msra.mxu1 %v757_v20  ;;  %v89_v32 = vld [vmem:[%s1072_s1 + $0x120] sm:$0xff]  ;;  %v90_v34 = vld [vmem:[%s1072_s1 + $0x128] sm:$0xff]  ;;  %v762_v8 = vcombine.high %v64_v2, %v68_v4  ;;  %v75_v10 = vld [vmem:[%s1072_s1 + $0xb0] sm:$0xff]  ;;  %v761_v14 = vcombine.low %v64_v2, %v68_v4 }
   0xb   :  { %402 = vmatprep.subr.bf16.mxu0 %v764_v21  ;;  %445 = vmatprep.subr.bf16.mxu1 %v766_v22  ;;  %v780_v37 = vcombine.high %v85_v31, %v89_v32  ;;  %v782_v38 = vcombine.high %v86_v33, %v90_v34  ;;  %v93_v39 = vld [vmem:[%s1072_s1 + $0x140] sm:$0xff]  ;;  %v94_v41 = vld [vmem:[%s1072_s1 + $0x148] sm:$0xff]  ;;  %v779_v43 = vcombine.low %v85_v31, %v89_v32  ;;  %v72_v11 = vld [vmem:[%s1072_s1 + $0x98] sm:$0xff] }
   0xc   :  { %v97_v40 = vld [vmem:[%s1072_s1 + $0x160] sm:$0xff]  ;;  %v98_v42 = vld [vmem:[%s1072_s1 + $0x168] sm:$0xff]  ;;  %v781_v44 = vcombine.low %v86_v33, %v90_v34  ;;  %v76_v12 = vld [vmem:[%s1072_s1 + $0xb8] sm:$0xff]  ;;  %v768_v15 = vcombine.high %v71_v9, %v75_v10  ;;  %v767_v21 = vcombine.low %v71_v9, %v75_v10 }
   0xd   :  { %v788_v45 = vcombine.high %v93_v39, %v97_v40  ;;  %v790_v46 = vcombine.high %v94_v41, %v98_v42  ;;  %v101_v47 = vld [vmem:[%s1072_s1 + $0x180] sm:$0xff]  ;;  %v102_v49 = vld [vmem:[%s1072_s1 + $0x188] sm:$0xff]  ;;  %v787_v51 = vcombine.low %v93_v39, %v97_v40  ;;  %v789_v52 = vcombine.low %v94_v41, %v98_v42  ;;  %v79_v17 = vld [vmem:[%s1072_s1 + $0xd0] sm:$0xff] }
   0xe   :  { %403 = vmatpush1.bf16.msra.mxu0 %v763_v27  ;;  %446 = vmatpush1.bf16.msra.mxu1 %v765_v28  ;;  %v105_v48 = vld [vmem:[%s1072_s1 + $0x1a0] sm:$0xff]  ;;  %v106_v50 = vld [vmem:[%s1072_s1 + $0x1a8] sm:$0xff]  ;;  %v770_v16 = vcombine.high %v72_v11, %v76_v12  ;;  %v83_v18 = vld [vmem:[%s1072_s1 + $0xf0] sm:$0xff]  ;;  %v769_v22 = vcombine.low %v72_v11, %v76_v12 }
   0xf   :  { %404 = vmatprep.subr.bf16.mxu0 %v772_v29  ;;  %447 = vmatprep.subr.bf16.mxu1 %v774_v30  ;;  %v796_v53 = vcombine.high %v101_v47, %v105_v48  ;;  %v798_v54 = vcombine.high %v102_v49, %v106_v50  ;;  %v795_v59 = vcombine.low %v101_v47, %v105_v48  ;;  %v958_v1 = vld [vmem:[%s1073_s0] sm:$0xff]   ;;  %v80_v19 = vld [vmem:[%s1072_s1 + $0xd8] sm:$0xff]  ;;  %v87_v25 = vld [vmem:[%s1072_s1 + $0x110] sm:$0xff] }
  0x10   :  { %v797_v60 = vcombine.low %v102_v49, %v106_v50  ;;  %v84_v20 = vld [vmem:[%s1072_s1 + $0xf8] sm:$0xff]  ;;  %v776_v23 = vcombine.high %v79_v17, %v83_v18  ;;  %v91_v26 = vld [vmem:[%s1072_s1 + $0x130] sm:$0xff]  ;;  %v775_v28 = vcombine.low %v79_v17, %v83_v18 }
  0x11   :  { %v778_v24 = vcombine.high %v80_v19, %v84_v20  ;;  %v92_v27 = vld [vmem:[%s1072_s1 + $0x138] sm:$0xff]  ;;  %v777_v29 = vcombine.low %v80_v19, %v84_v20  ;;  %v784_v30 = vcombine.high %v87_v25, %v91_v26  ;;  %v95_v32 = vld [vmem:[%s1072_s1 + $0x150] sm:$0xff] }
  0x12   :  { %405 = vmatpush1.bf16.msra.mxu0 %v771_v35  ;;  %448 = vmatpush1.bf16.msra.mxu1 %v773_v36  ;;  %v99_v33 = vld [vmem:[%s1072_s1 + $0x170] sm:$0xff]  ;;  %v96_v34 = vld [vmem:[%s1072_s1 + $0x158] sm:$0xff]  ;;  %v783_v36 = vcombine.low %v87_v25, %v91_v26 }
  0x13   :  { %406 = vmatprep.subr.bf16.mxu0 %v780_v37  ;;  %449 = vmatprep.subr.bf16.mxu1 %v782_v38  ;;  %v100_v35 = vld [vmem:[%s1072_s1 + $0x178] sm:$0xff]  ;;  %v792_v38 = vcombine.high %v95_v32, %v99_v33  ;;  %v103_v40 = vld [vmem:[%s1072_s1 + $0x190] sm:$0xff] }
  0x14   :  { %v794_v39 = vcombine.high %v96_v34, %v100_v35  ;;  %v107_v41 = vld [vmem:[%s1072_s1 + $0x1b0] sm:$0xff]  ;;  %v104_v42 = vld [vmem:[%s1072_s1 + $0x198] sm:$0xff] }
  0x15   :  { %v799_v48 = vcombine.low %v103_v40, %v107_v41 }
  0x16   :  { %407 = vmatpush1.bf16.msra.mxu0 %v779_v43  ;;  %450 = vmatpush1.bf16.msra.mxu1 %v781_v44  ;;  %v108_v43 = vld [vmem:[%s1072_s1 + $0x1b8] sm:$0xff]  ;;  %v791_v44 = vcombine.low %v95_v32, %v99_v33 }
  0x17   :  { %408 = vmatprep.subr.bf16.mxu0 %v788_v45  ;;  %451 = vmatprep.subr.bf16.mxu1 %v790_v46  ;;  %v793_v45 = vcombine.low %v96_v34, %v100_v35  ;;  %v800_v46 = vcombine.high %v103_v40, %v107_v41  ;;  %v802_v47 = vcombine.high %v104_v42, %v108_v43 }
  0x18   :  { %v801_v49 = vcombine.low %v104_v42, %v108_v43 }
  0x1a   :  { %409 = vmatpush1.bf16.msra.mxu0 %v787_v51  ;;  %452 = vmatpush1.bf16.msra.mxu1 %v789_v52 }
  0x1b   :  { %410 = vmatprep.subr.bf16.mxu0 %v796_v53  ;;  %453 = vmatprep.subr.bf16.mxu1 %v798_v54 }
  0x1e   :  { %411 = vmatpush1.bf16.msra.mxu0 %v795_v59  ;;  %454 = vmatpush1.bf16.msra.mxu1 %v797_v60 }
  0x1f   :  { %484 = vmatprep.subr.bf16.mxu0 %v752_v61  ;;  %527 = vmatprep.subr.bf16.mxu1 %v754_v62 }
  0x21   :  { %803 = vmatmul.mubr.msk.bf16.vlgmr.msra.gmra.mrb[0].mxu0 %vm394_vm0, %v958_v1  ;;  %804 = vmatmul.mubr.msk.bf16.vlgmr.msra.gmra.mrb[0].mxu1 %vm394_vm0, %v958_v1 }
  0x22   :  { %485 = vmatpush1.bf16.msra.mxu0 %v751_v5  ;;  %528 = vmatpush1.bf16.msra.mxu1 %v753_v6 }
  0x23   :  { %486 = vmatprep.subr.bf16.mxu0 %v760_v7  ;;  %529 = vmatprep.subr.bf16.mxu1 %v762_v8 }
  0x24   :  { %516 = vmatprep.mubr.bf16.mxu0 %v825_v3  ;;  %559 = vmatprep.mubr.bf16.mxu1 %v825_v3  ;;  %v88_v3 = vld [vmem:[%s1072_s1 + $0x118] sm:$0xff] }
  0x25   :  { %v786_v31 = vcombine.high %v88_v3, %v92_v27  ;;  %v785_v37 = vcombine.low %v88_v3, %v92_v27 }
  0x26   :  { %487 = vmatpush1.bf16.msra.mxu0 %v759_v13  ;;  %530 = vmatpush1.bf16.msra.mxu1 %v761_v14 }
  0x27   :  { %488 = vmatprep.subr.bf16.mxu0 %v768_v15  ;;  %531 = vmatprep.subr.bf16.mxu1 %v770_v16 }
  0x2a   :  { %489 = vmatpush1.bf16.msra.mxu0 %v767_v21  ;;  %532 = vmatpush1.bf16.msra.mxu1 %v769_v22 }
  0x2b   :  { %490 = vmatprep.subr.bf16.mxu0 %v776_v23  ;;  %533 = vmatprep.subr.bf16.mxu1 %v778_v24 }
  0x2e   :  { %491 = vmatpush1.bf16.msra.mxu0 %v775_v28  ;;  %534 = vmatpush1.bf16.msra.mxu1 %v777_v29 }
  0x2f   :  { %492 = vmatprep.subr.bf16.mxu0 %v784_v30  ;;  %535 = vmatprep.subr.bf16.mxu1 %v786_v31 }
  0x32   :  { %493 = vmatpush1.bf16.msra.mxu0 %v783_v36  ;;  %536 = vmatpush1.bf16.msra.mxu1 %v785_v37 }
  0x33   :  { %494 = vmatprep.subr.bf16.mxu0 %v792_v38  ;;  %537 = vmatprep.subr.bf16.mxu1 %v794_v39 }
  0x36   :  { %495 = vmatpush1.bf16.msra.mxu0 %v791_v44  ;;  %538 = vmatpush1.bf16.msra.mxu1 %v793_v45 }
  0x37   :  { %496 = vmatprep.subr.bf16.mxu0 %v800_v46  ;;  %539 = vmatprep.subr.bf16.mxu1 %v802_v47 }
  0x3a   :  { %497 = vmatpush1.bf16.msra.mxu0 %v799_v48  ;;  %540 = vmatpush1.bf16.msra.mxu1 %v801_v49 }
  0x3d   :  { %805 = vmatmul.mubr.msk.bf16.vlgmr.msra.gmra.mrb[4].mxu0 %vm394_vm0, %v958_v1  ;;  %806 = vmatmul.mubr.msk.bf16.vlgmr.msra.gmra.mrb[4].mxu1 %vm394_vm0, %v958_v1 }
  0xf4   :  { %v432_v50 = vpop.f32.mrb[0].mxu0  ;;  %v475_v53 = vpop.f32.mrb[0].mxu1 }
  0xf5   :  { %v698_v51 = vmul.f32 %v432_v50, %v432_v50  ;;  %v434_v52 = vpop.f32.mrb[1].mxu0  ;;  %v700_v58 = vmul.f32 %v475_v53, %v475_v53  ;;  %v477_v59 = vpop.f32.mrb[1].mxu1 }
  0xf6   :  { %v815_v54 = vpack.c.bf16 %v434_v52, %v432_v50  ;;  %v677_v55 = vadd.f32 %v434_v52, %v432_v50  ;;  %v699_v56 = vmul.f32 %v434_v52, %v434_v52  ;;  %v436_v57 = vpop.f32.mrb[2].mxu0  ;;  %v816_v62 = vpack.c.bf16 %v477_v59, %v475_v53  ;;  %v479_v0 = vpop.f32.mrb[2].mxu1 }
  0xf7   :  { %v706_v60 = vmul.f32 %v436_v57, %v436_v57  ;;  %v438_v61 = vpop.f32.mrb[3].mxu0  ;;  %v701_v63 = vmul.f32 %v477_v59, %v477_v59  ;;  %v481_v6 = vpop.f32.mrb[3].mxu1  ;;  %v708_v8 = vmul.f32 %v479_v0, %v479_v0 }
  0xf8   :  { %669 = vst [vmem:[%s1074_s2] sm:$0xff] %v815_v54  ;;  %v714_v1 = vadd.f32 %v699_v56, %v698_v51  ;;  %v678_v2 = vadd.f32 %v677_v55, %v475_v53  ;;  %v819_v4 = vpack.c.bf16 %v438_v61, %v436_v57  ;;  %v686_v5 = vadd.f32 %v438_v61, %v436_v57 }
  0xf9   :  { %v707_v7 = vmul.f32 %v438_v61, %v438_v61  ;;  %670 = vst [vmem:[%s1074_s2 + $0x8] sm:$0xff] %v816_v62  ;;  %v820_v9 = vpack.c.bf16 %v481_v6, %v479_v0  ;;  %v709_v17 = vmul.f32 %v481_v6, %v481_v6 }
  0xfa   :  { %v715_v10 = vadd.f32 %v714_v1, %v700_v58  ;;  %673 = vst [vmem:[%s1074_s2 + $0x20] sm:$0xff] %v819_v4  ;;  %v679_v11 = vadd.f32 %v678_v2, %v477_v59  ;;  %v687_v12 = vadd.f32 %v686_v5, %v479_v0 }
  0xfb   :  { %v723_v13 = vadd.f32 %v707_v7, %v706_v60  ;;  %674 = vst [vmem:[%s1074_s2 + $0x28] sm:$0xff] %v820_v9 }
  0xfc   :  { %v716_v14 = vadd.f32 %v715_v10, %v701_v63  ;;  %v688_v15 = vadd.f32 %v687_v12, %v481_v6 }
  0xfd   :  { %v724_v16 = vadd.f32 %v723_v13, %v708_v8 }
  0xff   :  { %v725_v18 = vadd.f32 %v724_v16, %v709_v17 }
 0x110   :  { %v518_v19 = vpop.f32.mrb[4].mxu0  ;;  %v561_v23 = vpop.f32.mrb[4].mxu1 }
 0x111   :  { %v680_v20 = vadd.f32 %v679_v11, %v518_v19  ;;  %v702_v21 = vmul.f32 %v518_v19, %v518_v19  ;;  %v520_v22 = vpop.f32.mrb[5].mxu0  ;;  %v563_v3 = vpop.f32.mrb[5].mxu1  ;;  %v704_v33 = vmul.f32 %v561_v23, %v561_v23 }
 0x112   :  { %v817_v24 = vpack.c.bf16 %v520_v22, %v518_v19  ;;  %v703_v25 = vmul.f32 %v520_v22, %v520_v22  ;;  %v522_v26 = vpop.f32.mrb[6].mxu0  ;;  %v565_v32 = vpop.f32.mrb[6].mxu1  ;;  %v818_v34 = vpack.c.bf16 %v563_v3, %v561_v23  ;;  %v705_v47 = vmul.f32 %v563_v3, %v563_v3 }
 0x113   :  { %v717_v27 = vadd.f32 %v716_v14, %v702_v21  ;;  %v681_v28 = vadd.f32 %v680_v20, %v520_v22  ;;  %v689_v29 = vadd.f32 %v688_v15, %v522_v26  ;;  %v710_v30 = vmul.f32 %v522_v26, %v522_v26  ;;  %v524_v31 = vpop.f32.mrb[7].mxu0  ;;  %v567_v37 = vpop.f32.mrb[7].mxu1 }
 0x114   :  { %671 = vst [vmem:[%s1074_s2 + $0x10] sm:$0xff] %v817_v24  ;;  %v821_v35 = vpack.c.bf16 %v524_v31, %v522_v26  ;;  %v711_v36 = vmul.f32 %v524_v31, %v524_v31  ;;  %v822_v40 = vpack.c.bf16 %v567_v37, %v565_v32  ;;  %672 = vst [vmem:[%s1074_s2 + $0x18] sm:$0xff] %v818_v34 }
 0x115   :  { %v726_v38 = vadd.f32 %v725_v18, %v710_v30  ;;  %v690_v39 = vadd.f32 %v689_v29, %v524_v31  ;;  %v682_v41 = vadd.f32 %v681_v28, %v561_v23  ;;  %v718_v42 = vadd.f32 %v717_v27, %v703_v25 }
 0x116   :  { %675 = vst [vmem:[%s1074_s2 + $0x30] sm:$0xff] %v821_v35  ;;  %v712_v44 = vmul.f32 %v565_v32, %v565_v32  ;;  %676 = vst [vmem:[%s1074_s2 + $0x38] sm:$0xff] %v822_v40  ;;  %v713_v49 = vmul.f32 %v567_v37, %v567_v37 }
 0x117   :  { %v727_v43 = vadd.f32 %v726_v38, %v711_v36  ;;  %v691_v45 = vadd.f32 %v690_v39, %v565_v32  ;;  %v683_v46 = vadd.f32 %v682_v41, %v563_v3  ;;  %v719_v48 = vadd.f32 %v718_v42, %v704_v33 }
 0x119   :  { %v692_v50 = vadd.f32 %v691_v45, %v567_v37  ;;  %v728_v51 = vadd.f32 %v727_v43, %v712_v44  ;;  %684 = vadd.xlane.f32.xlu0 %v683_v46  ;;  %v720_v52 = vadd.f32 %v719_v48, %v705_v47 }
 0x11b   :  { %v729_v53 = vadd.f32 %v728_v51, %v713_v49  ;;  %721 = vadd.xlane.f32.xlu1 %v720_v52 }
 0x11d   :  { %693 = vadd.xlane.f32.xlu0 %v692_v50 }
 0x11f   :  { %730 = vadd.xlane.f32.xlu1 %v729_v53 }
 0x1a6   :  { %v685_v54 = vpop.xlane.xlu0 %684 }
 0x1a7   :  { %696 = vst.msk [vmem:[%s1075_s3] sm:$0xff] %vm695_vm1, %v685_v54 }
 0x1a8   :  { %v722_v55 = vpop.xlane.xlu1 %721 }
 0x1a9   :  { %732 = vst.msk [vmem:[%s1076_s4] sm:$0xff] %vm695_vm1, %v722_v55 }
 0x1aa   :  { %v694_v56 = vpop.xlane.xlu0 %693 }
 0x1ab   :  { %697 = vst.msk [vmem:[%s1075_s3 + $0x8] sm:$0xff] %vm695_vm1, %v694_v56 }
 0x1ac   :  { %v731_v57 = vpop.xlane.xlu1 %730 }
 0x1ad   :  { %733 = vst.msk [vmem:[%s1076_s4 + $0x8] sm:$0xff] %vm695_vm1, %v731_v57 }

// kernel: generator_padding_forward.9
= control target key start
LH: loop header
LB: loop body
LE: loop exit
PB: predicated region body
PF: predicated region fallthrough
CT: control target
= control target key end

     0   :  { %s1597_s9 = smov 0   ;;  %s1599_s10 = smov 0   ;;  %s1907_s0 = inlined_call_operand.vmem [shape: bf16[8,64], index: 0, kind: input, shape index: {}]   ;;  %s1908_s1 = inlined_call_operand.vmem [shape: bf16[64,8192], index: 1, kind: input, shape index: {}]   ;;  %s1909_s2 = inlined_call_operand.vmem [shape: f32[8,8192], index: 2, kind: output, shape index: {}]  }
   0x1   :  { %s1601_s11 = smov 0   ;;  %s1603_s12 = smov 0  }
   0x2   :  { %s1605_s13 = smov 0  }
   0x3 LB: > { %s24_s14 = sadd.s32 1, %s1575_s12  ;;  %p66_p1 = scmp.ne.s32.totalorder %s1567_s10, %s1563_s9  ;;  %s1579_s13 = sphi %s1605_s13, %s12_s13   ;;  %s1575_s12 = sphi %s1603_s12, %s1913_s12   ;;  %s1571_s11 = sphi %s1601_s11, %s1912_s11   ;;  %s1567_s10 = sphi %s1599_s10, %s1911_s10   ;;  %s1563_s9 = sphi %s1597_s9, %s1910_s9  }
   0x4   : > { %p26_p0 = scmp.ge.s32.totalorder %s24_s14, 4  ;;  %p67_p2 = scmp.eq.s32.totalorder %s1579_s13, 0 }
   0x5   : > { %s59_s16 = sadd.s32 1, %s1567_s10  ;;  %p1337_p5 = scmp.ge.s32.totalorder %s1579_s13, 4 }
   0x6   : > { %s1915_s14 = smov (%p26_p0, %s24_s14), 0  ;;  %p68_p3 = por %p67_p2, %p66_p1 }
   0x7   : > { %s55_s15 = ssub.s32 %s1575_s12, %s1915_s14  ;;  %125 = sbr.rel (%p1337_p5) target bundleno = 50 (0x32), region = 20 }
   0x8   : > { %p57_p4 = scmp.eq.s32.totalorder %s55_s15, 0 }
   0xa   : > { %s1632_s17 = scalar_select %p57_p4, %s1567_s10, %s59_s16  }
   0xe   : > { %128 = sbr.rel (!%p68_p3) target bundleno = 50 (0x32), region = 24  ;;  %s130_s18 = sand.u32 (%p68_p3), 1, %s1567_s10  }
   0xf   : > { %s1435_s19 = sshll.u32 (%p68_p3), %s1575_s12, 6  ;;  %s1338_s20 = sshll.u32 (%p68_p3), %s130_s18, 9 }
  0x10   : > { %s1640_s23 = scalar_lea.vmem (%p68_p3), %s1908_s1, %s1435_s19  ;;  %s1645_s24 = scalar_lea.vmem (%p68_p3), [#allocation3], %s1338_s20 }
  0x11   : > { %v151_v0 = vld [vmem:[%s1640_s23] sm:$0xff] (%p68_p3)  ;;  %v153_v1 = vld [vmem:[%s1640_s23 + $0x8] sm:$0xff] (%p68_p3)  ;;  %v155_v2 = vld [vmem:[%s1640_s23 + $0x10] sm:$0xff] (%p68_p3) }
  0x12   : > { %152 = vst [vmem:[%s1645_s24] sm:$0xff] (%p68_p3), %v151_v0  ;;  %154 = vst [vmem:[%s1645_s24 + $0x8] sm:$0xff] (%p68_p3), %v153_v1  ;;  %v157_v3 = vld [vmem:[%s1640_s23 + $0x18] sm:$0xff] (%p68_p3)  ;;  %v159_v4 = vld [vmem:[%s1640_s23 + $0x20] sm:$0xff] (%p68_p3) }
  0x13   : > { %156 = vst [vmem:[%s1645_s24 + $0x10] sm:$0xff] (%p68_p3), %v155_v2  ;;  %v161_v5 = vld [vmem:[%s1640_s23 + $0x28] sm:$0xff] (%p68_p3)  ;;  %158 = vst [vmem:[%s1645_s24 + $0x18] sm:$0xff] (%p68_p3), %v157_v3  ;;  %v163_v6 = vld [vmem:[%s1640_s23 + $0x30] sm:$0xff] (%p68_p3) }
  0x14   : > { %160 = vst [vmem:[%s1645_s24 + $0x20] sm:$0xff] (%p68_p3), %v159_v4  ;;  %162 = vst [vmem:[%s1645_s24 + $0x28] sm:$0xff] (%p68_p3), %v161_v5  ;;  %v165_v7 = vld [vmem:[%s1640_s23 + $0x38] sm:$0xff] (%p68_p3)  ;;  %v167_v8 = vld [vmem:[%s1640_s23 + $0x100] sm:$0xff] (%p68_p3) }
  0x15   : > { %164 = vst [vmem:[%s1645_s24 + $0x30] sm:$0xff] %v163_v6  ;;  %166 = vst [vmem:[%s1645_s24 + $0x38] sm:$0xff] %v165_v7  ;;  %v169_v9 = vld [vmem:[%s1640_s23 + $0x108] sm:$0xff]  ;;  %v171_v10 = vld [vmem:[%s1640_s23 + $0x110] sm:$0xff] }
  0x16   : > { %168 = vst [vmem:[%s1645_s24 + $0x40] sm:$0xff] %v167_v8  ;;  %v173_v11 = vld [vmem:[%s1640_s23 + $0x118] sm:$0xff]  ;;  %170 = vst [vmem:[%s1645_s24 + $0x48] sm:$0xff] %v169_v9  ;;  %v175_v12 = vld [vmem:[%s1640_s23 + $0x120] sm:$0xff] }
  0x17   : > { %172 = vst [vmem:[%s1645_s24 + $0x50] sm:$0xff] %v171_v10  ;;  %174 = vst [vmem:[%s1645_s24 + $0x58] sm:$0xff] %v173_v11  ;;  %v177_v13 = vld [vmem:[%s1640_s23 + $0x128] sm:$0xff]  ;;  %v179_v14 = vld [vmem:[%s1640_s23 + $0x130] sm:$0xff] }
  0x18   : > { %176 = vst [vmem:[%s1645_s24 + $0x60] sm:$0xff] %v175_v12  ;;  %178 = vst [vmem:[%s1645_s24 + $0x68] sm:$0xff] %v177_v13  ;;  %v181_v15 = vld [vmem:[%s1640_s23 + $0x138] sm:$0xff]  ;;  %v183_v16 = vld [vmem:[%s1640_s23 + $0x200] sm:$0xff] }
  0x19   : > { %180 = vst [vmem:[%s1645_s24 + $0x70] sm:$0xff] %v179_v14  ;;  %v185_v17 = vld [vmem:[%s1640_s23 + $0x208] sm:$0xff]  ;;  %182 = vst [vmem:[%s1645_s24 + $0x78] sm:$0xff] %v181_v15  ;;  %v187_v18 = vld [vmem:[%s1640_s23 + $0x210] sm:$0xff] }
  0x1a   : > { %184 = vst [vmem:[%s1645_s24 + $0x80] sm:$0xff] %v183_v16  ;;  %186 = vst [vmem:[%s1645_s24 + $0x88] sm:$0xff] %v185_v17  ;;  %v189_v19 = vld [vmem:[%s1640_s23 + $0x218] sm:$0xff]  ;;  %v191_v20 = vld [vmem:[%s1640_s23 + $0x220] sm:$0xff] }
  0x1b   : > { %188 = vst [vmem:[%s1645_s24 + $0x90] sm:$0xff] %v187_v18  ;;  %190 = vst [vmem:[%s1645_s24 + $0x98] sm:$0xff] %v189_v19  ;;  %v193_v21 = vld [vmem:[%s1640_s23 + $0x228] sm:$0xff]  ;;  %v195_v22 = vld [vmem:[%s1640_s23 + $0x230] sm:$0xff] }
  0x1c   : > { %192 = vst [vmem:[%s1645_s24 + $0xa0] sm:$0xff] %v191_v20  ;;  %v197_v23 = vld [vmem:[%s1640_s23 + $0x238] sm:$0xff]  ;;  %194 = vst [vmem:[%s1645_s24 + $0xa8] sm:$0xff] %v193_v21  ;;  %v199_v24 = vld [vmem:[%s1640_s23 + $0x300] sm:$0xff] }
  0x1d   : > { %196 = vst [vmem:[%s1645_s24 + $0xb0] sm:$0xff] %v195_v22  ;;  %198 = vst [vmem:[%s1645_s24 + $0xb8] sm:$0xff] %v197_v23  ;;  %v201_v25 = vld [vmem:[%s1640_s23 + $0x308] sm:$0xff]  ;;  %v203_v26 = vld [vmem:[%s1640_s23 + $0x310] sm:$0xff] }
  0x1e   : > { %200 = vst [vmem:[%s1645_s24 + $0xc0] sm:$0xff] %v199_v24  ;;  %202 = vst [vmem:[%s1645_s24 + $0xc8] sm:$0xff] %v201_v25  ;;  %v205_v27 = vld [vmem:[%s1640_s23 + $0x318] sm:$0xff]  ;;  %v207_v28 = vld [vmem:[%s1640_s23 + $0x320] sm:$0xff] }
  0x1f   : > { %204 = vst [vmem:[%s1645_s24 + $0xd0] sm:$0xff] %v203_v26  ;;  %v209_v29 = vld [vmem:[%s1640_s23 + $0x328] sm:$0xff]  ;;  %206 = vst [vmem:[%s1645_s24 + $0xd8] sm:$0xff] %v205_v27  ;;  %v211_v30 = vld [vmem:[%s1640_s23 + $0x330] sm:$0xff] }
  0x20   : > { %208 = vst [vmem:[%s1645_s24 + $0xe0] sm:$0xff] %v207_v28  ;;  %210 = vst [vmem:[%s1645_s24 + $0xe8] sm:$0xff] %v209_v29  ;;  %v213_v31 = vld [vmem:[%s1640_s23 + $0x338] sm:$0xff]  ;;  %v215_v32 = vld [vmem:[%s1640_s23 + $0x400] sm:$0xff] }
  0x21   : > { %212 = vst [vmem:[%s1645_s24 + $0xf0] sm:$0xff] %v211_v30  ;;  %214 = vst [vmem:[%s1645_s24 + $0xf8] sm:$0xff] %v213_v31  ;;  %v217_v33 = vld [vmem:[%s1640_s23 + $0x408] sm:$0xff]  ;;  %v219_v34 = vld [vmem:[%s1640_s23 + $0x410] sm:$0xff] }
  0x22   : > { %216 = vst [vmem:[%s1645_s24 + $0x100] sm:$0xff] %v215_v32  ;;  %v221_v35 = vld [vmem:[%s1640_s23 + $0x418] sm:$0xff]  ;;  %218 = vst [vmem:[%s1645_s24 + $0x108] sm:$0xff] %v217_v33  ;;  %v223_v36 = vld [vmem:[%s1640_s23 + $0x420] sm:$0xff] }
  0x23   : > { %220 = vst [vmem:[%s1645_s24 + $0x110] sm:$0xff] %v219_v34  ;;  %222 = vst [vmem:[%s1645_s24 + $0x118] sm:$0xff] %v221_v35  ;;  %v225_v37 = vld [vmem:[%s1640_s23 + $0x428] sm:$0xff]  ;;  %v227_v38 = vld [vmem:[%s1640_s23 + $0x430] sm:$0xff] }
  0x24   : > { %224 = vst [vmem:[%s1645_s24 + $0x120] sm:$0xff] %v223_v36  ;;  %226 = vst [vmem:[%s1645_s24 + $0x128] sm:$0xff] %v225_v37  ;;  %v229_v39 = vld [vmem:[%s1640_s23 + $0x438] sm:$0xff]  ;;  %v231_v40 = vld [vmem:[%s1640_s23 + $0x500] sm:$0xff] }
  0x25   : > { %228 = vst [vmem:[%s1645_s24 + $0x130] sm:$0xff] %v227_v38  ;;  %v233_v41 = vld [vmem:[%s1640_s23 + $0x508] sm:$0xff]  ;;  %230 = vst [vmem:[%s1645_s24 + $0x138] sm:$0xff] %v229_v39  ;;  %v235_v42 = vld [vmem:[%s1640_s23 + $0x510] sm:$0xff] }
  0x26   : > { %232 = vst [vmem:[%s1645_s24 + $0x140] sm:$0xff] %v231_v40  ;;  %234 = vst [vmem:[%s1645_s24 + $0x148] sm:$0xff] %v233_v41  ;;  %v237_v43 = vld [vmem:[%s1640_s23 + $0x518] sm:$0xff]  ;;  %v239_v44 = vld [vmem:[%s1640_s23 + $0x520] sm:$0xff] }
  0x27   : > { %236 = vst [vmem:[%s1645_s24 + $0x150] sm:$0xff] %v235_v42  ;;  %238 = vst [vmem:[%s1645_s24 + $0x158] sm:$0xff] %v237_v43  ;;  %v241_v45 = vld [vmem:[%s1640_s23 + $0x528] sm:$0xff]  ;;  %v243_v46 = vld [vmem:[%s1640_s23 + $0x530] sm:$0xff] }
  0x28   : > { %240 = vst [vmem:[%s1645_s24 + $0x160] sm:$0xff] %v239_v44  ;;  %v245_v47 = vld [vmem:[%s1640_s23 + $0x538] sm:$0xff]  ;;  %242 = vst [vmem:[%s1645_s24 + $0x168] sm:$0xff] %v241_v45  ;;  %v247_v48 = vld [vmem:[%s1640_s23 + $0x600] sm:$0xff] }
  0x29   : > { %244 = vst [vmem:[%s1645_s24 + $0x170] sm:$0xff] %v243_v46  ;;  %246 = vst [vmem:[%s1645_s24 + $0x178] sm:$0xff] %v245_v47  ;;  %v249_v49 = vld [vmem:[%s1640_s23 + $0x608] sm:$0xff]  ;;  %v251_v50 = vld [vmem:[%s1640_s23 + $0x610] sm:$0xff] }
  0x2a   : > { %248 = vst [vmem:[%s1645_s24 + $0x180] sm:$0xff] %v247_v48  ;;  %250 = vst [vmem:[%s1645_s24 + $0x188] sm:$0xff] %v249_v49  ;;  %v253_v51 = vld [vmem:[%s1640_s23 + $0x618] sm:$0xff]  ;;  %v255_v52 = vld [vmem:[%s1640_s23 + $0x620] sm:$0xff] }
  0x2b   : > { %252 = vst [vmem:[%s1645_s24 + $0x190] sm:$0xff] %v251_v50  ;;  %v257_v53 = vld [vmem:[%s1640_s23 + $0x628] sm:$0xff]  ;;  %254 = vst [vmem:[%s1645_s24 + $0x198] sm:$0xff] %v253_v51  ;;  %v259_v54 = vld [vmem:[%s1640_s23 + $0x630] sm:$0xff] }
  0x2c   : > { %256 = vst [vmem:[%s1645_s24 + $0x1a0] sm:$0xff] %v255_v52  ;;  %258 = vst [vmem:[%s1645_s24 + $0x1a8] sm:$0xff] %v257_v53  ;;  %v261_v55 = vld [vmem:[%s1640_s23 + $0x638] sm:$0xff]  ;;  %v263_v56 = vld [vmem:[%s1640_s23 + $0x700] sm:$0xff] }
  0x2d   : > { %260 = vst [vmem:[%s1645_s24 + $0x1b0] sm:$0xff] %v259_v54  ;;  %262 = vst [vmem:[%s1645_s24 + $0x1b8] sm:$0xff] %v261_v55  ;;  %v265_v57 = vld [vmem:[%s1640_s23 + $0x708] sm:$0xff]  ;;  %v267_v58 = vld [vmem:[%s1640_s23 + $0x710] sm:$0xff] }
  0x2e   : > { %264 = vst [vmem:[%s1645_s24 + $0x1c0] sm:$0xff] %v263_v56  ;;  %v269_v59 = vld [vmem:[%s1640_s23 + $0x718] sm:$0xff]  ;;  %266 = vst [vmem:[%s1645_s24 + $0x1c8] sm:$0xff] %v265_v57  ;;  %v271_v60 = vld [vmem:[%s1640_s23 + $0x720] sm:$0xff] }
  0x2f   : > { %268 = vst [vmem:[%s1645_s24 + $0x1d0] sm:$0xff] %v267_v58  ;;  %270 = vst [vmem:[%s1645_s24 + $0x1d8] sm:$0xff] %v269_v59  ;;  %v273_v61 = vld [vmem:[%s1640_s23 + $0x728] sm:$0xff]  ;;  %v275_v62 = vld [vmem:[%s1640_s23 + $0x730] sm:$0xff] }
  0x30   : > { %272 = vst [vmem:[%s1645_s24 + $0x1e0] sm:$0xff] %v271_v60  ;;  %274 = vst [vmem:[%s1645_s24 + $0x1e8] sm:$0xff] %v273_v61  ;;  %v277_v63 = vld [vmem:[%s1640_s23 + $0x738] sm:$0xff] }
  0x31   : > { %276 = vst [vmem:[%s1645_s24 + $0x1f0] sm:$0xff] %v275_v62  ;;  %278 = vst [vmem:[%s1645_s24 + $0x1f8] sm:$0xff] %v277_v63 }
  0x32 PF: > { %p1341_p6 = scmp.ge.s32.totalorder %s1579_s13, 1  ;;  %p283_p7 = scmp.lt.s32.totalorder %s1579_s13, 5 }
  0x34   : > { %p284_p8 = pnand %p1341_p6, %p283_p7 }
  0x35   : > { %s290_s25 = sand.u32 (!%p284_p8), 1, %s1563_s9   ;;  %v1581_v0 = vmov (!%p284_p8), 0   ;;  %v1806_v43 = vld [vmem:[%s1907_s0] sm:$0xf] (!%p284_p8)  ;;  %vm749_vm0 = vcmask (!%p284_p8), 523264   ;;  %s1343_s30 = sshll.u32 (!%p284_p8), %s1571_s11, 4 }
  0x36   : > { %287 = sbr.rel (%p284_p8) target bundleno = 369 (0x171), region = 47  ;;  %s1342_s26 = sshll.u32 (!%p284_p8), %s290_s25, 9  ;;  %785 = vmatprep.mubr.bf16.mxu0 (!%p284_p8), %v1581_v0  ;;  %826 = vmatprep.mubr.bf16.mxu1 (!%p284_p8), %v1581_v0 }
  0x37   : > { %s1777_s27 = scalar_lea.vmem (!%p284_p8), [#allocation3], %s1342_s26  ;;  %p322_p9 = scmp.lt.s32.totalorder (!%p284_p8), %s1343_s30, 63 }
  0x38   : > { %v365_v1 = vld [vmem:[%s1777_s27] sm:$0xff] (!%p284_p8)  ;;  %v366_v3 = vld [vmem:[%s1777_s27 + $0x8] sm:$0xff] (!%p284_p8)  ;;  %v367_v31 = vld [vmem:[%s1777_s27 + $0x10] sm:$0xff] (!%p284_p8) }
  0x39   : > { %v373_v2 = vld [vmem:[%s1777_s27 + $0x40] sm:$0xff] (!%p284_p8)  ;;  %v374_v5 = vld [vmem:[%s1777_s27 + $0x48] sm:$0xff] (!%p284_p8)  ;;  %v375_v32 = vld [vmem:[%s1777_s27 + $0x50] sm:$0xff] (!%p284_p8) }
  0x3a   : > { %v1346_v4 = vcombine.high (!%p284_p8), %v365_v1, %v373_v2  ;;  %v1345_v6 = vcombine.low (!%p284_p8), %v365_v1, %v373_v2  ;;  %v381_v7 = vld [vmem:[%s1777_s27 + $0x80] sm:$0xff] (!%p284_p8)  ;;  %v1348_v9 = vcombine.high (!%p284_p8), %v366_v3, %v374_v5  ;;  %v1347_v10 = vcombine.low (!%p284_p8), %v366_v3, %v374_v5  ;;  %v382_v12 = vld [vmem:[%s1777_s27 + $0x88] sm:$0xff] (!%p284_p8)  ;;  %v368_v33 = vld [vmem:[%s1777_s27 + $0x18] sm:$0xff] (!%p284_p8) }
  0x3b   : > { %v389_v8 = vld [vmem:[%s1777_s27 + $0xc0] sm:$0xff] (!%p284_p8)  ;;  %v390_v13 = vld [vmem:[%s1777_s27 + $0xc8] sm:$0xff] (!%p284_p8)  ;;  %v376_v34 = vld [vmem:[%s1777_s27 + $0x58] sm:$0xff] (!%p284_p8)  ;;  %v1350_v37 = vcombine.high (!%p284_p8), %v367_v31, %v375_v32  ;;  %v1349_v44 = vcombine.low (!%p284_p8), %v367_v31, %v375_v32 }
  0x3c   : > { %v1362_v11 = vcombine.high (!%p284_p8), %v381_v7, %v389_v8  ;;  %v397_v14 = vld [vmem:[%s1777_s27 + $0x100] sm:$0xff] (!%p284_p8)  ;;  %753 = vmatprep.subr.bf16.mxu0 (!%p284_p8), %v1346_v4  ;;  %v1364_v15 = vcombine.high (!%p284_p8), %v382_v12, %v390_v13  ;;  %v398_v17 = vld [vmem:[%s1777_s27 + $0x108] sm:$0xff] (!%p284_p8)  ;;  %794 = vmatprep.subr.bf16.mxu1 (!%p284_p8), %v1348_v9  ;;  %v1361_v19 = vcombine.low (!%p284_p8), %v381_v7, %v389_v8  ;;  %v383_v39 = vld [vmem:[%s1777_s27 + $0x90] sm:$0xff] (!%p284_p8) }
  0x3d   : > { %v405_v16 = vld [vmem:[%s1777_s27 + $0x140] sm:$0xff]  ;;  %v406_v18 = vld [vmem:[%s1777_s27 + $0x148] sm:$0xff]  ;;  %754 = vmatpush1.bf16.msra.mxu0 %v1345_v6  ;;  %795 = vmatpush1.bf16.msra.mxu1 %v1347_v10  ;;  %v1363_v20 = vcombine.low %v382_v12, %v390_v13  ;;  %v1352_v38 = vcombine.high %v368_v33, %v376_v34  ;;  %v391_v40 = vld [vmem:[%s1777_s27 + $0xd0] sm:$0xff]  ;;  %v1351_v45 = vcombine.low %v368_v33, %v376_v34  ;;  %s1917_s30 = smov (!%p322_p9, %s1343_s30), 63 }
  0x3e   : > { %755 = vmatprep.subr.bf16.mxu0 %v1362_v11  ;;  %v1378_v21 = vcombine.high %v397_v14, %v405_v16  ;;  %796 = vmatprep.subr.bf16.mxu1 %v1364_v15  ;;  %v1380_v22 = vcombine.high %v398_v17, %v406_v18  ;;  %v413_v23 = vld [vmem:[%s1777_s27 + $0x180] sm:$0xff]  ;;  %v414_v25 = vld [vmem:[%s1777_s27 + $0x188] sm:$0xff]  ;;  %v1377_v27 = vcombine.low %v397_v14, %v405_v16  ;;  %v384_v41 = vld [vmem:[%s1777_s27 + $0x98] sm:$0xff]  ;;  %s1344_s3 = sshll.u32 %s1917_s30, 3 }
  0x3f   : > { %v421_v24 = vld [vmem:[%s1777_s27 + $0x1c0] sm:$0xff]  ;;  %v422_v26 = vld [vmem:[%s1777_s27 + $0x1c8] sm:$0xff]  ;;  %v1379_v28 = vcombine.low %v398_v17, %v406_v18  ;;  %v392_v42 = vld [vmem:[%s1777_s27 + $0xd8] sm:$0xff]  ;;  %v1366_v46 = vcombine.high %v383_v39, %v391_v40  ;;  %v1365_v52 = vcombine.low %v383_v39, %v391_v40  ;;  %s1874_s6 = scalar_lea.vmem %s1909_s2, %s1344_s3 }
  0x40   : > { %v1394_v29 = vcombine.high %v413_v23, %v421_v24  ;;  %v1396_v30 = vcombine.high %v414_v25, %v422_v26  ;;  %v1393_v35 = vcombine.low %v413_v23, %v421_v24  ;;  %v1395_v36 = vcombine.low %v414_v25, %v422_v26  ;;  %v399_v48 = vld [vmem:[%s1777_s27 + $0x110] sm:$0xff]  ;;  %v400_v50 = vld [vmem:[%s1777_s27 + $0x118] sm:$0xff]  ;;  %v369_v1 = vld [vmem:[%s1777_s27 + $0x20] sm:$0xff] }
  0x41   : > { %756 = vmatpush1.bf16.msra.mxu0 %v1361_v19  ;;  %797 = vmatpush1.bf16.msra.mxu1 %v1363_v20  ;;  %v1368_v47 = vcombine.high %v384_v41, %v392_v42  ;;  %v407_v49 = vld [vmem:[%s1777_s27 + $0x150] sm:$0xff]  ;;  %v408_v51 = vld [vmem:[%s1777_s27 + $0x158] sm:$0xff]  ;;  %v1367_v53 = vcombine.low %v384_v41, %v392_v42  ;;  %v377_v2 = vld [vmem:[%s1777_s27 + $0x60] sm:$0xff] }
  0x42   : > { %757 = vmatprep.subr.bf16.mxu0 %v1378_v21  ;;  %798 = vmatprep.subr.bf16.mxu1 %v1380_v22  ;;  %v1382_v54 = vcombine.high %v399_v48, %v407_v49  ;;  %v1384_v55 = vcombine.high %v400_v50, %v408_v51  ;;  %v415_v56 = vld [vmem:[%s1777_s27 + $0x190] sm:$0xff]  ;;  %v416_v58 = vld [vmem:[%s1777_s27 + $0x198] sm:$0xff]  ;;  %v1381_v60 = vcombine.low %v399_v48, %v407_v49  ;;  %v370_v3 = vld [vmem:[%s1777_s27 + $0x28] sm:$0xff] }
  0x43   : > { %v423_v57 = vld [vmem:[%s1777_s27 + $0x1d0] sm:$0xff]  ;;  %v424_v59 = vld [vmem:[%s1777_s27 + $0x1d8] sm:$0xff]  ;;  %v1383_v61 = vcombine.low %v400_v50, %v408_v51  ;;  %v378_v4 = vld [vmem:[%s1777_s27 + $0x68] sm:$0xff]  ;;  %v1354_v7 = vcombine.high %v369_v1, %v377_v2  ;;  %v1353_v13 = vcombine.low %v369_v1, %v377_v2 }
  0x44   : > { %v1398_v62 = vcombine.high %v415_v56, %v423_v57  ;;  %v1400_v63 = vcombine.high %v416_v58, %v424_v59  ;;  %v1397_v5 = vcombine.low %v415_v56, %v423_v57  ;;  %v1399_v6 = vcombine.low %v416_v58, %v424_v59  ;;  %v385_v9 = vld [vmem:[%s1777_s27 + $0xa0] sm:$0xff]  ;;  %v386_v11 = vld [vmem:[%s1777_s27 + $0xa8] sm:$0xff]  ;;  %v371_v33 = vld [vmem:[%s1777_s27 + $0x30] sm:$0xff] }
  0x45   : > { %758 = vmatpush1.bf16.msra.mxu0 %v1377_v27  ;;  %799 = vmatpush1.bf16.msra.mxu1 %v1379_v28  ;;  %v1356_v8 = vcombine.high %v370_v3, %v378_v4  ;;  %v393_v10 = vld [vmem:[%s1777_s27 + $0xe0] sm:$0xff]  ;;  %v394_v12 = vld [vmem:[%s1777_s27 + $0xe8] sm:$0xff]  ;;  %v1355_v14 = vcombine.low %v370_v3, %v378_v4  ;;  %v379_v34 = vld [vmem:[%s1777_s27 + $0x70] sm:$0xff] }
  0x46   : > { %759 = vmatprep.subr.bf16.mxu0 %v1394_v29  ;;  %800 = vmatprep.subr.bf16.mxu1 %v1396_v30  ;;  %v1370_v15 = vcombine.high %v385_v9, %v393_v10  ;;  %v1372_v16 = vcombine.high %v386_v11, %v394_v12  ;;  %v401_v17 = vld [vmem:[%s1777_s27 + $0x120] sm:$0xff]  ;;  %v402_v19 = vld [vmem:[%s1777_s27 + $0x128] sm:$0xff]  ;;  %v1369_v21 = vcombine.low %v385_v9, %v393_v10  ;;  %v387_v41 = vld [vmem:[%s1777_s27 + $0xb0] sm:$0xff] }
  0x47   : > { %v409_v18 = vld [vmem:[%s1777_s27 + $0x160] sm:$0xff]  ;;  %v410_v20 = vld [vmem:[%s1777_s27 + $0x168] sm:$0xff]  ;;  %v1371_v22 = vcombine.low %v386_v11, %v394_v12  ;;  %v1358_v39 = vcombine.high %v371_v33, %v379_v34  ;;  %v395_v42 = vld [vmem:[%s1777_s27 + $0xf0] sm:$0xff] }
  0x48   : > { %v1386_v23 = vcombine.high %v401_v17, %v409_v18  ;;  %v1388_v24 = vcombine.high %v402_v19, %v410_v20  ;;  %v417_v25 = vld [vmem:[%s1777_s27 + $0x1a0] sm:$0xff]  ;;  %v418_v27 = vld [vmem:[%s1777_s27 + $0x1a8] sm:$0xff]  ;;  %v1385_v29 = vcombine.low %v401_v17, %v409_v18  ;;  %v1387_v30 = vcombine.low %v402_v19, %v410_v20  ;;  %v403_v50 = vld [vmem:[%s1777_s27 + $0x130] sm:$0xff] }
  0x49   : > { %760 = vmatpush1.bf16.msra.mxu0 %v1393_v35  ;;  %801 = vmatpush1.bf16.msra.mxu1 %v1395_v36  ;;  %v425_v26 = vld [vmem:[%s1777_s27 + $0x1e0] sm:$0xff]  ;;  %v426_v28 = vld [vmem:[%s1777_s27 + $0x1e8] sm:$0xff]  ;;  %v372_v35 = vld [vmem:[%s1777_s27 + $0x38] sm:$0xff]  ;;  %v1374_v48 = vcombine.high %v387_v41, %v395_v42 }
  0x4a   : > { %835 = vmatprep.subr.bf16.mxu0 %v1350_v37  ;;  %876 = vmatprep.subr.bf16.mxu1 %v1352_v38  ;;  %v1402_v31 = vcombine.high %v417_v25, %v425_v26  ;;  %v1404_v32 = vcombine.high %v418_v27, %v426_v28  ;;  %v380_v36 = vld [vmem:[%s1777_s27 + $0x78] sm:$0xff]  ;;  %v1401_v37 = vcombine.low %v417_v25, %v425_v26  ;;  %v411_v51 = vld [vmem:[%s1777_s27 + $0x170] sm:$0xff] }
  0x4b   : > { %v1403_v38 = vcombine.low %v418_v27, %v426_v28  ;;  %v1360_v40 = vcombine.high %v372_v35, %v380_v36  ;;  %v1390_v56 = vcombine.high %v403_v50, %v411_v51  ;;  %v419_v58 = vld [vmem:[%s1777_s27 + $0x1b0] sm:$0xff] }
  0x4c   : > { %1409 = vmatmul.mubr.msk.bf16.vlgmr.msra.gmra.mrb[0].mxu0 %vm749_vm0, %v1806_v43  ;;  %1410 = vmatmul.mubr.msk.bf16.vlgmr.msra.gmra.mrb[0].mxu1 %vm749_vm0, %v1806_v43  ;;  %v427_v59 = vld [vmem:[%s1777_s27 + $0x1f0] sm:$0xff] }
  0x4d   : > { %836 = vmatpush1.bf16.msra.mxu0 %v1349_v44  ;;  %877 = vmatpush1.bf16.msra.mxu1 %v1351_v45  ;;  %v388_v44 = vld [vmem:[%s1777_s27 + $0xb8] sm:$0xff]  ;;  %v1406_v1 = vcombine.high %v419_v58, %v427_v59  ;;  %v1405_v3 = vcombine.low %v419_v58, %v427_v59 }
  0x4e   : > { %837 = vmatprep.subr.bf16.mxu0 %v1366_v46  ;;  %878 = vmatprep.subr.bf16.mxu1 %v1368_v47  ;;  %v396_v45 = vld [vmem:[%s1777_s27 + $0xf8] sm:$0xff]  ;;  %v1357_v46 = vcombine.low %v371_v33, %v379_v34  ;;  %v1359_v47 = vcombine.low %v372_v35, %v380_v36 }
  0x4f   : > { %867 = vmatprep.mubr.bf16.mxu0 %v1581_v0  ;;  %908 = vmatprep.mubr.bf16.mxu1 %v1581_v0  ;;  %v1376_v49 = vcombine.high %v388_v44, %v396_v45 }
  0x51   : > { %838 = vmatpush1.bf16.msra.mxu0 %v1365_v52  ;;  %879 = vmatpush1.bf16.msra.mxu1 %v1367_v53  ;;  %v404_v52 = vld [vmem:[%s1777_s27 + $0x138] sm:$0xff] }
  0x52   : > { %839 = vmatprep.subr.bf16.mxu0 %v1382_v54  ;;  %880 = vmatprep.subr.bf16.mxu1 %v1384_v55  ;;  %v412_v53 = vld [vmem:[%s1777_s27 + $0x178] sm:$0xff]  ;;  %v1373_v54 = vcombine.low %v387_v41, %v395_v42  ;;  %v1375_v55 = vcombine.low %v388_v44, %v396_v45 }
  0x53   : > { %v1392_v57 = vcombine.high %v404_v52, %v412_v53 }
  0x55   : > { %840 = vmatpush1.bf16.msra.mxu0 %v1381_v60  ;;  %881 = vmatpush1.bf16.msra.mxu1 %v1383_v61  ;;  %v420_v60 = vld [vmem:[%s1777_s27 + $0x1b8] sm:$0xff] }
  0x56   : > { %841 = vmatprep.subr.bf16.mxu0 %v1398_v62  ;;  %882 = vmatprep.subr.bf16.mxu1 %v1400_v63  ;;  %v428_v61 = vld [vmem:[%s1777_s27 + $0x1f8] sm:$0xff]  ;;  %v1389_v62 = vcombine.low %v403_v50, %v411_v51  ;;  %v1391_v63 = vcombine.low %v404_v52, %v412_v53 }
  0x57   : > { %v1408_v2 = vcombine.high %v420_v60, %v428_v61  ;;  %v1407_v4 = vcombine.low %v420_v60, %v428_v61 }
  0x59   : > { %842 = vmatpush1.bf16.msra.mxu0 %v1397_v5  ;;  %883 = vmatpush1.bf16.msra.mxu1 %v1399_v6 }
  0x5a   : > { %917 = vmatprep.subr.bf16.mxu0 %v1354_v7  ;;  %958 = vmatprep.subr.bf16.mxu1 %v1356_v8 }
  0x5c   : > { %1411 = vmatmul.mubr.msk.bf16.vlgmr.msra.gmra.mrb[4].mxu0 %vm749_vm0, %v1806_v43  ;;  %1412 = vmatmul.mubr.msk.bf16.vlgmr.msra.gmra.mrb[4].mxu1 %vm749_vm0, %v1806_v43 }
  0x5d   : > { %918 = vmatpush1.bf16.msra.mxu0 %v1353_v13  ;;  %959 = vmatpush1.bf16.msra.mxu1 %v1355_v14 }
  0x5e   : > { %919 = vmatprep.subr.bf16.mxu0 %v1370_v15  ;;  %960 = vmatprep.subr.bf16.mxu1 %v1372_v16 }
  0x5f   : > { %949 = vmatprep.mubr.bf16.mxu0 %v1581_v0  ;;  %990 = vmatprep.mubr.bf16.mxu1 %v1581_v0 }
  0x61   : > { %920 = vmatpush1.bf16.msra.mxu0 %v1369_v21  ;;  %961 = vmatpush1.bf16.msra.mxu1 %v1371_v22 }
  0x62   : > { %921 = vmatprep.subr.bf16.mxu0 %v1386_v23  ;;  %962 = vmatprep.subr.bf16.mxu1 %v1388_v24 }
  0x65   : > { %922 = vmatpush1.bf16.msra.mxu0 %v1385_v29  ;;  %963 = vmatpush1.bf16.msra.mxu1 %v1387_v30 }
  0x66   : > { %923 = vmatprep.subr.bf16.mxu0 %v1402_v31  ;;  %964 = vmatprep.subr.bf16.mxu1 %v1404_v32 }
  0x69   : > { %924 = vmatpush1.bf16.msra.mxu0 %v1401_v37  ;;  %965 = vmatpush1.bf16.msra.mxu1 %v1403_v38 }
  0x6a   : > { %999 = vmatprep.subr.bf16.mxu0 %v1358_v39  ;;  %1040 = vmatprep.subr.bf16.mxu1 %v1360_v40 }
  0x6c   : > { %1413 = vmatmul.mubr.msk.bf16.vlgmr.msra.gmra.mrb[8].mxu0 %vm749_vm0, %v1806_v43  ;;  %1414 = vmatmul.mubr.msk.bf16.vlgmr.msra.gmra.mrb[8].mxu1 %vm749_vm0, %v1806_v43 }
  0x6d   : > { %1000 = vmatpush1.bf16.msra.mxu0 %v1357_v46  ;;  %1041 = vmatpush1.bf16.msra.mxu1 %v1359_v47 }
  0x6e   : > { %1001 = vmatprep.subr.bf16.mxu0 %v1374_v48  ;;  %1042 = vmatprep.subr.bf16.mxu1 %v1376_v49 }
  0x6f   : > { %1031 = vmatprep.mubr.bf16.mxu0 %v1581_v0  ;;  %1072 = vmatprep.mubr.bf16.mxu1 %v1581_v0 }
  0x71   : > { %1002 = vmatpush1.bf16.msra.mxu0 %v1373_v54  ;;  %1043 = vmatpush1.bf16.msra.mxu1 %v1375_v55 }
  0x72   : > { %1003 = vmatprep.subr.bf16.mxu0 %v1390_v56  ;;  %1044 = vmatprep.subr.bf16.mxu1 %v1392_v57 }
  0x75   : > { %1004 = vmatpush1.bf16.msra.mxu0 %v1389_v62  ;;  %1045 = vmatpush1.bf16.msra.mxu1 %v1391_v63 }
  0x76   : > { %1005 = vmatprep.subr.bf16.mxu0 %v1406_v1  ;;  %1046 = vmatprep.subr.bf16.mxu1 %v1408_v2 }
  0x79   : > { %1006 = vmatpush1.bf16.msra.mxu0 %v1405_v3  ;;  %1047 = vmatpush1.bf16.msra.mxu1 %v1407_v4 }
  0x7c   : > { %1415 = vmatmul.mubr.msk.bf16.vlgmr.msra.gmra.mrb[12].mxu0 %vm749_vm0, %v1806_v43  ;;  %1416 = vmatmul.mubr.msk.bf16.vlgmr.msra.gmra.mrb[12].mxu1 %vm749_vm0, %v1806_v43 }
 0x11f   : > { %v787_v0 = vpop.f32.mrb[0].mxu0  ;;  %v828_v6 = vpop.f32.mrb[0].mxu1 }
 0x120   : > { %v1417_v5 = vmul.f32 -1.442695, %v787_v0  ;;  %v789_v7 = vpop.f32.mrb[1].mxu0  ;;  %v1419_v8 = vmul.f32 -1.442695, %v828_v6  ;;  %v830_v10 = vpop.f32.mrb[1].mxu1 }
 0x121   : > { %v1418_v9 = vmul.f32 -1.442695, %v789_v7  ;;  %v791_v11 = vpop.f32.mrb[2].mxu0  ;;  %v1420_v12 = vmul.f32 -1.442695, %v830_v10  ;;  %v832_v13 = vpop.f32.mrb[2].mxu1 }
 0x122   : > { %1477 = vpow2.f32 %v1417_v5  ;;  %v792_v14 = vpop.f32.mrb[3].mxu0  ;;  %v833_v15 = vpop.f32.mrb[3].mxu1 }
 0x123   : > { %1479 = vpow2.f32 %v1419_v8 }
 0x124   : > { %1481 = vpow2.f32 %v1418_v9 }
 0x125   : > { %1483 = vpow2.f32 %v1420_v12 }
 0x12c   : > { %v1478_v16 = vpop.eup %1477 }
 0x12d   : > { %v1480_v43 = vpop.eup %1479  ;;  %v1180_v17 = vadd.f32 1.0, %v1478_v16 }
 0x12e   : > { %v1482_v18 = vpop.eup %1481  ;;  %v1182_v19 = vadd.f32 1.0, %v1480_v43 }
 0x12f   : > { %v1484_v20 = vpop.eup %1483  ;;  %1485 = vrcp.f32 %v1180_v17  ;;  %v1181_v21 = vadd.f32 1.0, %v1482_v18  ;;  %v869_v22 = vpop.f32.mrb[4].mxu0 }
 0x130   : > { %1487 = vrcp.f32 %v1182_v19  ;;  %v1183_v23 = vadd.f32 1.0, %v1484_v20  ;;  %v1421_v24 = vmul.f32 -1.442695, %v869_v22  ;;  %v910_v25 = vpop.f32.mrb[4].mxu1  ;;  %v871_v26 = vpop.f32.mrb[5].mxu0 }
 0x131   : > { %1489 = vrcp.f32 %v1181_v21  ;;  %v1423_v27 = vmul.f32 -1.442695, %v910_v25  ;;  %v1422_v28 = vmul.f32 -1.442695, %v871_v26  ;;  %v912_v29 = vpop.f32.mrb[5].mxu1  ;;  %v873_v30 = vpop.f32.mrb[6].mxu0 }
 0x132   : > { %1491 = vrcp.f32 %v1183_v23  ;;  %v1424_v31 = vmul.f32 -1.442695, %v912_v29  ;;  %v914_v32 = vpop.f32.mrb[6].mxu1  ;;  %v874_v33 = vpop.f32.mrb[7].mxu0 }
 0x133   : > { %1493 = vpow2.f32 %v1421_v24  ;;  %v915_v34 = vpop.f32.mrb[7].mxu1 }
 0x134   : > { %1495 = vpow2.f32 %v1423_v27 }
 0x135   : > { %1497 = vpow2.f32 %v1422_v28 }
 0x136   : > { %1499 = vpow2.f32 %v1424_v31 }
 0x139   : > { %v1486_v35 = vpop.eup %1485 }
 0x13a   : > { %v1488_v36 = vpop.eup %1487  ;;  %1228 = vst [vmem:[%s1874_s6] sm:$0xff] %v1486_v35 }
 0x13b   : > { %v1490_v37 = vpop.eup %1489  ;;  %1230 = vst [vmem:[%s1874_s6 + $0x10] sm:$0xff] %v1488_v36 }
 0x13c   : > { %v1492_v38 = vpop.eup %1491  ;;  %1229 = vst [vmem:[%s1874_s6 + $0x8] sm:$0xff] %v1490_v37 }
 0x13d   : > { %v1494_v39 = vpop.eup %1493  ;;  %1231 = vst [vmem:[%s1874_s6 + $0x18] sm:$0xff] %v1492_v38 }
 0x13e   : > { %v1496_v40 = vpop.eup %1495  ;;  %v1184_v41 = vadd.f32 1.0, %v1494_v39 }
 0x13f   : > { %v1498_v42 = vpop.eup %1497  ;;  %v1186_v44 = vadd.f32 1.0, %v1496_v40  ;;  %v951_v45 = vpop.f32.mrb[8].mxu0 }
 0x140   : > { %v1500_v46 = vpop.eup %1499  ;;  %1501 = vrcp.f32 %v1184_v41  ;;  %v1185_v47 = vadd.f32 1.0, %v1498_v42  ;;  %v1425_v48 = vmul.f32 -1.442695, %v951_v45  ;;  %v992_v49 = vpop.f32.mrb[8].mxu1 }
 0x141   : > { %v953_v50 = vpop.f32.mrb[9].mxu0  ;;  %1503 = vrcp.f32 %v1186_v44  ;;  %v1187_v51 = vadd.f32 1.0, %v1500_v46  ;;  %v1427_v52 = vmul.f32 -1.442695, %v992_v49  ;;  %v994_v53 = vpop.f32.mrb[9].mxu1 }
 0x142   : > { %1505 = vrcp.f32 %v1185_v47  ;;  %v1426_v54 = vmul.f32 -1.442695, %v953_v50  ;;  %v955_v55 = vpop.f32.mrb[10].mxu0  ;;  %v996_v56 = vpop.f32.mrb[10].mxu1  ;;  %v1428_v57 = vmul.f32 -1.442695, %v994_v53 }
 0x143   : > { %1507 = vrcp.f32 %v1187_v51  ;;  %v956_v58 = vpop.f32.mrb[11].mxu0  ;;  %v997_v59 = vpop.f32.mrb[11].mxu1 }
 0x144   : > { %1509 = vpow2.f32 %v1425_v48 }
 0x145   : > { %1511 = vpow2.f32 %v1427_v52 }
 0x146   : > { %1513 = vpow2.f32 %v1426_v54 }
 0x147   : > { %1515 = vpow2.f32 %v1428_v57 }
 0x14a   : > { %v1502_v60 = vpop.eup %1501 }
 0x14b   : > { %v1504_v61 = vpop.eup %1503  ;;  %1232 = vst [vmem:[%s1874_s6 + $0x20] sm:$0xff] %v1502_v60 }
 0x14c   : > { %v1506_v62 = vpop.eup %1505  ;;  %1234 = vst [vmem:[%s1874_s6 + $0x30] sm:$0xff] %v1504_v61 }
 0x14d   : > { %v1508_v63 = vpop.eup %1507  ;;  %1233 = vst [vmem:[%s1874_s6 + $0x28] sm:$0xff] %v1506_v62 }
 0x14e   : > { %v1510_v1 = vpop.eup %1509  ;;  %1235 = vst [vmem:[%s1874_s6 + $0x38] sm:$0xff] %v1508_v63 }
 0x14f   : > { %v1512_v2 = vpop.eup %1511  ;;  %v1188_v3 = vadd.f32 1.0, %v1510_v1  ;;  %v1033_v4 = vpop.f32.mrb[12].mxu0 }
 0x150   : > { %v1514_v0 = vpop.eup %1513  ;;  %v1190_v5 = vadd.f32 1.0, %v1512_v2  ;;  %v1074_v6 = vpop.f32.mrb[12].mxu1  ;;  %v1429_v10 = vmul.f32 -1.442695, %v1033_v4 }
 0x151   : > { %v1035_v7 = vpop.f32.mrb[13].mxu0  ;;  %v1516_v8 = vpop.eup %1515  ;;  %1517 = vrcp.f32 %v1188_v3  ;;  %v1189_v9 = vadd.f32 1.0, %v1514_v0  ;;  %v1431_v13 = vmul.f32 -1.442695, %v1074_v6 }
 0x152   : > { %v1076_v11 = vpop.f32.mrb[13].mxu1  ;;  %1519 = vrcp.f32 %v1190_v5  ;;  %v1191_v12 = vadd.f32 1.0, %v1516_v8  ;;  %v1037_v14 = vpop.f32.mrb[14].mxu0  ;;  %v1430_v16 = vmul.f32 -1.442695, %v1035_v7 }
 0x153   : > { %v1078_v15 = vpop.f32.mrb[14].mxu1  ;;  %1521 = vrcp.f32 %v1189_v9  ;;  %v1038_v43 = vpop.f32.mrb[15].mxu0  ;;  %v1432_v18 = vmul.f32 -1.442695, %v1076_v11 }
 0x154   : > { %v1079_v17 = vpop.f32.mrb[15].mxu1  ;;  %1523 = vrcp.f32 %v1191_v12 }
 0x155   : > { %1525 = vpow2.f32 %v1429_v10 }
 0x156   : > { %1527 = vpow2.f32 %v1431_v13 }
 0x157   : > { %1529 = vpow2.f32 %v1430_v16 }
 0x158   : > { %1531 = vpow2.f32 %v1432_v18 }
 0x15b   : > { %v1518_v19 = vpop.eup %1517 }
 0x15c   : > { %v1520_v20 = vpop.eup %1519  ;;  %1236 = vst [vmem:[%s1874_s6 + $0x40] sm:$0xff] %v1518_v19 }
 0x15d   : > { %v1522_v21 = vpop.eup %1521  ;;  %1238 = vst [vmem:[%s1874_s6 + $0x50] sm:$0xff] %v1520_v20 }
 0x15e   : > { %v1524_v22 = vpop.eup %1523  ;;  %1237 = vst [vmem:[%s1874_s6 + $0x48] sm:$0xff] %v1522_v21 }
 0x15f   : > { %v1526_v23 = vpop.eup %1525  ;;  %1239 = vst [vmem:[%s1874_s6 + $0x58] sm:$0xff] %v1524_v22 }
 0x160   : > { %v1528_v24 = vpop.eup %1527  ;;  %v1192_v25 = vadd.f32 1.0, %v1526_v23 }
 0x161   : > { %v1530_v26 = vpop.eup %1529  ;;  %v1194_v27 = vadd.f32 1.0, %v1528_v24 }
 0x162   : > { %v1532_v28 = vpop.eup %1531  ;;  %1533 = vrcp.f32 %v1192_v25  ;;  %v1193_v29 = vadd.f32 1.0, %v1530_v26 }
 0x163   : > { %1535 = vrcp.f32 %v1194_v27  ;;  %v1195_v30 = vadd.f32 1.0, %v1532_v28 }
 0x164   : > { %1537 = vrcp.f32 %v1193_v29 }
 0x165   : > { %1539 = vrcp.f32 %v1195_v30 }
 0x16c   : > { %v1534_v31 = vpop.eup %1533 }
 0x16d   : > { %v1536_v32 = vpop.eup %1535  ;;  %1240 = vst [vmem:[%s1874_s6 + $0x60] sm:$0xff] %v1534_v31 }
 0x16e   : > { %v1538_v33 = vpop.eup %1537  ;;  %1242 = vst [vmem:[%s1874_s6 + $0x70] sm:$0xff] %v1536_v32 }
 0x16f   : > { %v1540_v34 = vpop.eup %1539  ;;  %1241 = vst [vmem:[%s1874_s6 + $0x68] sm:$0xff] %v1538_v33 }
 0x170   : > { %1243 = vst [vmem:[%s1874_s6 + $0x78] sm:$0xff] %v1540_v34 }
 0x171 PF: > { %s12_s13 = sadd.s32 1, %s1579_s13   ;;  %s1910_s9 = smov %s1567_s10 }
 0x172   : > { %p9_p10 = scmp.ge.s32.totalorder %s12_s13, 6   ;;  %s1911_s10 = smov %s1632_s17 }
 0x173   : > { %s1912_s11 = smov %s1575_s12  ;;  %s1913_s12 = smov %s1915_s14 }
 0x174   :  { %11 = sbr.rel (!%p9_p10) target bundleno = 3 (0x3), region = 97 }

</bundles_post_ra>
